<compile_context>
chip_gen: v7x
topology: tpu7x:2x2x1
jax: 0.10.0
libtpu: 0.0.40
codegen_flags: <defaults>
</compile_context>

<pallas_src>
import functools

import jax
import jax.numpy as jnp
from jax.experimental import pallas as pl
from jax.experimental.pallas import tpu as pltpu


def _round_up(n: int, m: int) -> int:
    return ((n + m - 1) // m) * m


# ----------------------------------------------------------------------------
# Pallas kernel: one batch tile of the full MLP (+ softmax / 2-class sigmoid).
# ----------------------------------------------------------------------------
def _policy_kernel(x_ref, w1_ref, w2_ref, w3_ref, b_ref, out_ref, *, actions,
                   two_class):
    x = x_ref[...]                                # [TB, S]
    w1 = w1_ref[...]                              # [S, H]
    w2 = w2_ref[...]                              # [H, H]
    w3 = w3_ref[...]                              # [H, A]  (D-folded if two_class)
    b1 = b_ref[0:1, :]                            # [1, H]
    b2 = b_ref[1:2, :]                            # [1, H]
    b3 = b_ref[2:3, :actions]                     # [1, A]  (D-folded if two_class)

    h1 = jnp.tanh(jnp.dot(x, w1, preferred_element_type=jnp.float32) + b1)
    h2 = jnp.tanh(jnp.dot(h1, w2, preferred_element_type=jnp.float32) + b2)
    d = jnp.dot(h2, w3, preferred_element_type=jnp.float32) + b3   # [TB, A]

    if two_class:
        # w3/b3 were pre-multiplied by D=[[-1,1],[1,-1]] on the host, so
        # d[:, i] = l_other - l_i and p_i = 1/(1+exp(d[:, i])) is the exact softmax.
        # (For |d| > ~88 exp overflows to inf -> p == 0.0 exactly; harmless for the
        #  forward pass, clamp d if log-prob is fused later.)
        out_ref[...] = 1.0 / (1.0 + jnp.exp(d))
    else:
        # Generic numerically-stable softmax fallback (d holds raw logits).
        m = jnp.max(d, axis=-1, keepdims=True)
        e = jnp.exp(d - m)
        out_ref[...] = e / jnp.sum(e, axis=-1, keepdims=True)


# ----------------------------------------------------------------------------
# Host-side parameter packing (done once, reused every forward call).
# ----------------------------------------------------------------------------
def pack_policy_params(params):
    """Pack per-layer params into 4 DMA-friendly operands: w1, w2, w3', bias slab.

    For action_size == 2 the 2x2 difference matrix is folded into w3/b3 here so the
    kernel's two-class sigmoid path needs no extra matmul.
    """
    w1 = jnp.asarray(params["w1"], jnp.float32)            # [S, H]
    w2 = jnp.asarray(params["w2"], jnp.float32)            # [H, H]
    w3 = jnp.asarray(params["w3"], jnp.float32)            # [H, A]
    b1 = jnp.asarray(params["b1"], jnp.float32).reshape(-1)
    b2 = jnp.asarray(params["b2"], jnp.float32).reshape(-1)
    b3 = jnp.asarray(params["b3"], jnp.float32).reshape(-1)

    S, H = w1.shape
    A = w3.shape[1]
    assert w2.shape == (H, H) and A <= H
    assert b1.shape == (H,) and b2.shape == (H,) and b3.shape == (A,)

    if A == 2:
        dmat = jnp.array([[-1.0, 1.0], [1.0, -1.0]], jnp.float32)
        w3 = jnp.dot(w3, dmat)                              # [H, 2]
        b3 = jnp.dot(b3, dmat)                              # [2]

    b = jnp.zeros((3, H), jnp.float32)
    b = b.at[0, :].set(b1)
    b = b.at[1, :].set(b2)
    b = b.at[2, :A].set(b3)

    return w1, w2, w3, b


# ----------------------------------------------------------------------------
# Forward wrapper.
# ----------------------------------------------------------------------------
def policy_forward(x, w1, w2, w3, b, *, action_size, block_b=1024):
    """softmax(fc3(tanh(fc2(tanh(fc1(x)))))) via one gridded pallas_call.

    x: [B, state_size] float32; returns [B, action_size] float32 probabilities.
    """
    S, H = w1.shape
    A = int(action_size)
    B = x.shape[0]
    assert x.shape[1] == S
    assert w2.shape == (H, H) and w3.shape == (H, A) and b.shape == (3, H)

    x = x.astype(jnp.float32)

    # Padding-free tile whenever B <= block_b: TB = round_up(B, 8) -> grid=(1,).
    # (On v7x one could instead split into 2 padding-free tiles of round_up(B/2, 8)
    #  rows to use both TensorCores; at this size a single tile is usually faster.)
    TB = _round_up(min(B, block_b), 8)
    Bp = _round_up(B, TB)
    xp = jnp.pad(x, ((0, Bp - B), (0, 0))) if Bp != B else x

    kernel = functools.partial(_policy_kernel, actions=A, two_class=(A == 2))

    flops = 2 * Bp * (S * H + H * H + H * A)
    bytes_accessed = 4 * (Bp * S + S * H + H * H + H * A + 3 * H + Bp * A)

    out = pl.pallas_call(
        kernel,
        out_shape=jax.ShapeDtypeStruct((Bp, A), jnp.float32),
        grid_spec=pltpu.PrefetchScalarGridSpec(
            num_scalar_prefetch=0,
            grid=(Bp // TB,),
            in_specs=[
                pl.BlockSpec((TB, S), lambda i: (i, 0)),     # streamed batch tile
                pl.BlockSpec((S, H), lambda i: (0, 0)),      # weights stay resident
                pl.BlockSpec((H, H), lambda i: (0, 0)),
                pl.BlockSpec((H, A), lambda i: (0, 0)),
                pl.BlockSpec((3, H), lambda i: (0, 0)),
            ],
            out_specs=pl.BlockSpec((TB, A), lambda i: (i, 0)),
        ),
        compiler_params=pltpu.CompilerParams(
            dimension_semantics=("parallel",),   # shards batch tiles across TCs (v7x)
        ),
        cost_estimate=pl.CostEstimate(
            flops=flops,
            transcendentals=Bp * (2 * H + A),
            bytes_accessed=bytes_accessed,
        ),
    )(xp, w1, w2, w3, b)

    return out[:B] if Bp != B else out


# ----------------------------------------------------------------------------
# Deterministic init (mirrors nn.init.orthogonal_(gain=1.0) + zero bias).
# ----------------------------------------------------------------------------
def _orthogonal(key, rows, cols, gain=1.0):
    n = max(rows, cols)
    a = jax.random.normal(key, (n, n), dtype=jnp.float32)
    q, r = jnp.linalg.qr(a)
    q = q * jnp.sign(jnp.diag(r))[None, :]
    return (gain * q[:rows, :cols]).astype(jnp.float32)


def init_policy_params(key, state_size, action_size, hidden=64):
    k1, k2, k3 = jax.random.split(key, 3)
    w1_t = _orthogonal(k1, hidden, state_size)      # torch layout [out, in]
    w2_t = _orthogonal(k2, hidden, hidden)
    w3_t = _orthogonal(k3, action_size, hidden)
    return {
        "w1": w1_t.T, "b1": jnp.zeros((hidden,), jnp.float32),        # [S, H]
        "w2": w2_t.T, "b2": jnp.zeros((hidden,), jnp.float32),        # [H, H]
        "w3": w3_t.T, "b3": jnp.zeros((action_size,), jnp.float32),   # [H, A]
    }


# Pure-JAX reference (high-precision matmuls, unpacked params) for correctness check.
def policy_forward_ref(x, params):
    hi = jax.lax.Precision.HIGHEST
    h1 = jnp.tanh(jnp.dot(x, params["w1"], precision=hi) + params["b1"])
    h2 = jnp.tanh(jnp.dot(h1, params["w2"], precision=hi) + params["b2"])
    logits = jnp.dot(h2, params["w3"], precision=hi) + params["b3"]
    m = jnp.max(logits, axis=-1, keepdims=True)
    e = jnp.exp(logits - m)
    return e / jnp.sum(e, axis=-1, keepdims=True)


# ----------------------------------------------------------------------------
# Main
# ----------------------------------------------------------------------------
if __name__ == "__main__":
    STATE_SIZE = 4     # CartPole observation
    ACTION_SIZE = 2    # CartPole actions
    BATCH = 400        # batched rollout states -> TB=400, grid=(1,), zero padding

    key = jax.random.PRNGKey(0)
    k_params, k_x = jax.random.split(key)

    params = init_policy_params(k_params, STATE_SIZE, ACTION_SIZE)
    w1_p, w2_p, w3_p, b_p = pack_policy_params(params)   # pack once, reuse every step
    x = jax.random.normal(k_x, (BATCH, STATE_SIZE), dtype=jnp.float32)

    fwd = jax.jit(functools.partial(policy_forward, action_size=ACTION_SIZE))
    probs = fwd(x, w1_p, w2_p, w3_p, b_p)
    jax.block_until_ready(probs)

    # Sanity: shape, rows sum to 1, and agreement with the pure-JAX reference forward.
    assert probs.shape == (BATCH, ACTION_SIZE)
    row_sums = jnp.sum(probs, axis=-1)
    assert bool(jnp.allclose(row_sums, jnp.ones_like(row_sums), atol=1e-5))
    ref = policy_forward_ref(x, params)
    assert bool(jnp.allclose(probs, ref, atol=2e-3)), float(jnp.max(jnp.abs(probs - ref)))

    print("KERNEL_OK")
</pallas_src>

<mosaic_0001>
module attributes {stable_mosaic.version = 11 : i64} {
  func.func @_policy_kernel(%arg0: i32, %arg1: memref<400x4xf32, #tpu.memory_space<vmem>>, %arg2: memref<4x64xf32, #tpu.memory_space<vmem>>, %arg3: memref<64x64xf32, #tpu.memory_space<vmem>>, %arg4: memref<64x2xf32, #tpu.memory_space<vmem>>, %arg5: memref<3x64xf32, #tpu.memory_space<vmem>>, %arg6: memref<400x2xf32, #tpu.memory_space<vmem>>) attributes {dimension_semantics = [#tpu.dimension_semantics<parallel>], iteration_bounds = array<i64: 1>, scalar_prefetch = 0 : i64, scratch_operands = 0 : i64, tpu.core_type = #tpu.core_type<tc>, window_params = [{transform_indices = @transform_0, window_bounds = array<i64: 400, 4>}, {pipeline_mode = #tpu.pipeline_mode<synchronous>, transform_indices = @transform_1, window_bounds = array<i64: 4, 64>}, {pipeline_mode = #tpu.pipeline_mode<synchronous>, transform_indices = @transform_2, window_bounds = array<i64: 64, 64>}, {pipeline_mode = #tpu.pipeline_mode<synchronous>, transform_indices = @transform_3, window_bounds = array<i64: 64, 2>}, {pipeline_mode = #tpu.pipeline_mode<synchronous>, transform_indices = @transform_4, window_bounds = array<i64: 3, 64>}, {transform_indices = @transform_5, window_bounds = array<i64: 400, 2>}]} {
    %c0 = arith.constant 0 : index
    %c0_0 = arith.constant 0 : index
    %0 = vector.load %arg1[%c0, %c0_0] : memref<400x4xf32, #tpu.memory_space<vmem>>, vector<400x4xf32>
    %c0_1 = arith.constant 0 : index
    %c0_2 = arith.constant 0 : index
    %1 = vector.load %arg2[%c0_1, %c0_2] : memref<4x64xf32, #tpu.memory_space<vmem>>, vector<4x64xf32>
    %c0_3 = arith.constant 0 : index
    %c0_4 = arith.constant 0 : index
    %2 = vector.load %arg3[%c0_3, %c0_4] : memref<64x64xf32, #tpu.memory_space<vmem>>, vector<64x64xf32>
    %c0_5 = arith.constant 0 : index
    %c0_6 = arith.constant 0 : index
    %3 = vector.load %arg4[%c0_5, %c0_6] : memref<64x2xf32, #tpu.memory_space<vmem>>, vector<64x2xf32>
    %c0_7 = arith.constant 0 : index
    %c0_8 = arith.constant 0 : index
    %4 = vector.load %arg5[%c0_7, %c0_8] : memref<3x64xf32, #tpu.memory_space<vmem>>, vector<1x64xf32>
    %c1 = arith.constant 1 : index
    %c0_9 = arith.constant 0 : index
    %5 = vector.load %arg5[%c1, %c0_9] : memref<3x64xf32, #tpu.memory_space<vmem>>, vector<1x64xf32>
    %c2 = arith.constant 2 : index
    %c0_10 = arith.constant 0 : index
    %6 = vector.load %arg5[%c2, %c0_10] : memref<3x64xf32, #tpu.memory_space<vmem>>, vector<1x2xf32>
    %cst = arith.constant dense<0.000000e+00> : vector<400x64xf32>
    %7 = tpu.matmul %0, %1, %cst {dimension_numbers = #tpu.dot_dimension_numbers<[1], [0], [0], [1], [0, 0, 1, 1], [], []>} : vector<400x4xf32>, vector<4x64xf32>, vector<400x64xf32> -> vector<400x64xf32>
    %8 = vector.broadcast %4 : vector<1x64xf32> to vector<400x64xf32>
    %9 = arith.addf %7, %8 : vector<400x64xf32>
    %10 = math.tanh %9 : vector<400x64xf32>
    %cst_11 = arith.constant dense<0.000000e+00> : vector<400x64xf32>
    %11 = tpu.matmul %10, %2, %cst_11 {dimension_numbers = #tpu.dot_dimension_numbers<[1], [0], [0], [1], [0, 0, 1, 1], [], []>} : vector<400x64xf32>, vector<64x64xf32>, vector<400x64xf32> -> vector<400x64xf32>
    %12 = vector.broadcast %5 : vector<1x64xf32> to vector<400x64xf32>
    %13 = arith.addf %11, %12 : vector<400x64xf32>
    %14 = math.tanh %13 : vector<400x64xf32>
    %cst_12 = arith.constant dense<0.000000e+00> : vector<400x2xf32>
    %15 = tpu.matmul %14, %3, %cst_12 {dimension_numbers = #tpu.dot_dimension_numbers<[1], [0], [0], [1], [0, 0, 1, 1], [], []>} : vector<400x64xf32>, vector<64x2xf32>, vector<400x2xf32> -> vector<400x2xf32>
    %16 = vector.broadcast %6 : vector<1x2xf32> to vector<400x2xf32>
    %17 = arith.addf %15, %16 : vector<400x2xf32>
    %18 = math.exp %17 : vector<400x2xf32>
    %cst_13 = arith.constant 1.000000e+00 : f32
    %19 = vector.broadcast %cst_13 : f32 to vector<400x2xf32>
    %20 = arith.addf %19, %18 : vector<400x2xf32>
    %cst_14 = arith.constant 1.000000e+00 : f32
    %21 = vector.broadcast %cst_14 : f32 to vector<400x2xf32>
    %22 = arith.divf %21, %20 : vector<400x2xf32>
    %c0_15 = arith.constant 0 : index
    %c0_16 = arith.constant 0 : index
    %23 = vector.load %arg6[%c0_15, %c0_16] : memref<400x2xf32, #tpu.memory_space<vmem>>, vector<400x2xf32>
    tpu.vector_store %arg6[%c0_15, %c0_16], %22 {strides = array<i32>} : memref<400x2xf32, #tpu.memory_space<vmem>>, vector<400x2xf32>,
    return
  }
  func.func @transform_0(%arg0: i32) -> (i32, i32) {
    %c0_i32 = arith.constant 0 : i32
    %c0_i32_0 = arith.constant 0 : i32
    return %arg0, %c0_i32 : i32, i32
  }
  func.func @transform_1(%arg0: i32) -> (i32, i32) {
    %c0_i32 = arith.constant 0 : i32
    %c0_i32_0 = arith.constant 0 : i32
    %c0_i32_1 = arith.constant 0 : i32
    return %c0_i32, %c0_i32_0 : i32, i32
  }
  func.func @transform_2(%arg0: i32) -> (i32, i32) {
    %c0_i32 = arith.constant 0 : i32
    %c0_i32_0 = arith.constant 0 : i32
    %c0_i32_1 = arith.constant 0 : i32
    return %c0_i32, %c0_i32_0 : i32, i32
  }
  func.func @transform_3(%arg0: i32) -> (i32, i32) {
    %c0_i32 = arith.constant 0 : i32
    %c0_i32_0 = arith.constant 0 : i32
    %c0_i32_1 = arith.constant 0 : i32
    return %c0_i32, %c0_i32_0 : i32, i32
  }
  func.func @transform_4(%arg0: i32) -> (i32, i32) {
    %c0_i32 = arith.constant 0 : i32
    %c0_i32_0 = arith.constant 0 : i32
    %c0_i32_1 = arith.constant 0 : i32
    return %c0_i32, %c0_i32_0 : i32, i32
  }
  func.func @transform_5(%arg0: i32) -> (i32, i32) {
    %c0_i32 = arith.constant 0 : i32
    %c0_i32_0 = arith.constant 0 : i32
    return %arg0, %c0_i32 : i32, i32
  }
}

</mosaic_0001>

<bundles_post_ra>
// kernel: policy_forward.1
= control target key start
LH: loop header
LB: loop body
LE: loop exit
PB: predicated region body
PF: predicated region fallthrough
CT: control target
= control target key end

     0   :  { %vm245_vm0 = vcmask 1043456   ;;  %vm94_vm1 = vcmask 31744   ;;  %vm618_vm2 = vcmask 523264   ;;  %vm1853_vm3 = vcmask 15360   ;;  %s3740_s1 = inlined_call_operand.vmem [shape: f32[4,64], index: 1, kind: input, shape index: {}]   ;;  %s3741_s0 = inlined_call_operand.vmem [shape: f32[400,4], index: 0, kind: input, shape index: {}]   ;;  %s3742_s2 = inlined_call_operand.vmem [shape: f32[64,64], index: 2, kind: input, shape index: {}]   ;;  %s3743_s3 = inlined_call_operand.vmem [shape: f32[64,2], index: 3, kind: input, shape index: {}]   ;;  %s3744_s4 = inlined_call_operand.vmem [shape: f32[3,64], index: 4, kind: input, shape index: {}]   ;;  %s3745_s5 = inlined_call_operand.vmem [shape: f32[400,2], index: 5, kind: output, shape index: {}]  }
   0x1   :  { %v70_v0 = vld [vmem:[%s3740_s1] sm:$0xf]  ;;  %v21_v2 = vld [vmem:[%s3741_s0 + $0x8] sm:$0xff]  ;;  %v22_v3 = vld [vmem:[%s3741_s0 + $0x10] sm:$0xff] }
   0x2   :  { %v20_v1 = vld [vmem:[%s3741_s0] sm:$0xff]  ;;  %2229 = vmatprep.subr.msk.mxu0 %vm245_vm0, %v70_v0  ;;  %2520 = vmatprep.subr.msk.mxu1 %vm245_vm0, %v70_v0  ;;  %v23_v4 = vld [vmem:[%s3741_s0 + $0x18] sm:$0xff]  ;;  %v25_v6 = vld [vmem:[%s3741_s0 + $0x28] sm:$0xff] }
   0x3   :  { %2231 = vmatprep.mubr.msk.f32.mxu0 %vm94_vm1, %v20_v1  ;;  %2230 = vmatpush3.msk.msra.mxu0 %vm245_vm0, %v70_v0  ;;  %v24_v5 = vld [vmem:[%s3741_s0 + $0x20] sm:$0xff]  ;;  %v26_v7 = vld [vmem:[%s3741_s0 + $0x30] sm:$0xff]  ;;  %v47_v9 = vld [vmem:[%s3741_s0 + $0xd8] sm:$0xff] }
   0x4   :  { %2232 = vmatmul.mubr.msk.f32.vlgmr.msra.gmra.mrb[0].mxu0 %vm94_vm1, %v21_v2  ;;  %2521 = vmatpush3.msk.msra.mxu1 %vm245_vm0, %v70_v0  ;;  %v46_v8 = vld [vmem:[%s3741_s0 + $0xd0] sm:$0xff]  ;;  %v48_v10 = vld [vmem:[%s3741_s0 + $0xe0] sm:$0xff]  ;;  %v27_v11 = vld [vmem:[%s3741_s0 + $0x38] sm:$0xff] }
   0x5   :  { %2234 = vmatprep.mubr.msk.f32.mxu0 %vm94_vm1, %v22_v3  ;;  %2270 = vmatprep.mubr.msk.f32.mxu1 %vm94_vm1, %v46_v8  ;;  %v49_v12 = vld [vmem:[%s3741_s0 + $0xe8] sm:$0xff]  ;;  %v28_v13 = vld [vmem:[%s3741_s0 + $0x40] sm:$0xff]  ;;  %v50_v14 = vld [vmem:[%s3741_s0 + $0xf0] sm:$0xff] }
   0x6   :  { %2271 = vmatmul.mubr.msk.f32.vlgmr.msra.gmra.mrb[0].mxu1 %vm94_vm1, %v47_v9  ;;  %v29_v15 = vld [vmem:[%s3741_s0 + $0x48] sm:$0xff]  ;;  %v30_v16 = vld [vmem:[%s3741_s0 + $0x50] sm:$0xff]  ;;  %v51_v17 = vld [vmem:[%s3741_s0 + $0xf8] sm:$0xff] }
   0x7   :  { %2273 = vmatprep.mubr.msk.f32.mxu1 %vm94_vm1, %v48_v10  ;;  %v52_v18 = vld [vmem:[%s3741_s0 + $0x100] sm:$0xff]  ;;  %v72_v20 = vld [vmem:[%s3742_s2 + $0x8] sm:$0xff]  ;;  %v73_v22 = vld [vmem:[%s3742_s2 + $0x10] sm:$0xff] }
   0x8   :  { %2235 = vmatmul.mubr.msk.f32.gmra.mrb[2].mxu0 %vm94_vm1, %v23_v4  ;;  %v71_v19 = vld [vmem:[%s3742_s2] sm:$0xff]  ;;  %v74_v23 = vld [vmem:[%s3742_s2 + $0x18] sm:$0xff]  ;;  %v53_v25 = vld [vmem:[%s3741_s0 + $0x108] sm:$0xff] }
   0x9   :  { %2237 = vmatprep.mubr.msk.f32.mxu0 %vm94_vm1, %v24_v5  ;;  %v2488_v21 = vpack.c.bf16 %v72_v20, %v71_v19  ;;  %v31_v24 = vld [vmem:[%s3741_s0 + $0x58] sm:$0xff]  ;;  %v32_v26 = vld [vmem:[%s3741_s0 + $0x60] sm:$0xff]  ;;  %v54_v27 = vld [vmem:[%s3741_s0 + $0x110] sm:$0xff]  ;;  %v2492_v28 = vpack.c.bf16 %v74_v23, %v73_v22 }
   0xa   :  { %2274 = vmatmul.mubr.msk.f32.gmra.mrb[2].mxu1 %vm94_vm1, %v49_v12  ;;  %v75_v29 = vld [vmem:[%s3742_s2 + $0x20] sm:$0xff]  ;;  %v76_v30 = vld [vmem:[%s3742_s2 + $0x28] sm:$0xff]  ;;  %v55_v32 = vld [vmem:[%s3741_s0 + $0x118] sm:$0xff] }
   0xb   :  { %2276 = vmatprep.mubr.msk.f32.mxu1 %vm94_vm1, %v50_v14  ;;  %2489 = vmatprep.subr.bf16.mxu1 %v2488_v21  ;;  %v33_v31 = vld [vmem:[%s3741_s0 + $0x68] sm:$0xff]  ;;  %v34_v33 = vld [vmem:[%s3741_s0 + $0x70] sm:$0xff]  ;;  %v56_v34 = vld [vmem:[%s3741_s0 + $0x120] sm:$0xff]  ;;  %v2496_v35 = vpack.c.bf16 %v76_v30, %v75_v29 }
   0xc   :  { %2238 = vmatmul.mubr.msk.f32.gmra.mrb[4].mxu0 %vm94_vm1, %v25_v6  ;;  %2491 = vmatpush3.bf16.msra.mxu1 %v2488_v21  ;;  %v35_v36 = vld [vmem:[%s3741_s0 + $0x78] sm:$0xff]  ;;  %v57_v37 = vld [vmem:[%s3741_s0 + $0x128] sm:$0xff]  ;;  %v36_v38 = vld [vmem:[%s3741_s0 + $0x80] sm:$0xff] }
   0xd   :  { %2240 = vmatprep.mubr.msk.f32.mxu0 %vm94_vm1, %v26_v7  ;;  %2493 = vmatprep.subr.bf16.mxu1 %v2492_v28  ;;  %v58_v39 = vld [vmem:[%s3741_s0 + $0x130] sm:$0xff]  ;;  %v37_v40 = vld [vmem:[%s3741_s0 + $0x88] sm:$0xff]  ;;  %v59_v41 = vld [vmem:[%s3741_s0 + $0x138] sm:$0xff] }
   0xe   :  { %2277 = vmatmul.mubr.msk.f32.gmra.mrb[4].mxu1 %vm94_vm1, %v51_v17  ;;  %v38_v42 = vld [vmem:[%s3741_s0 + $0x90] sm:$0xff]  ;;  %v60_v43 = vld [vmem:[%s3741_s0 + $0x140] sm:$0xff]  ;;  %v39_v44 = vld [vmem:[%s3741_s0 + $0x98] sm:$0xff] }
   0xf   :  { %2279 = vmatprep.mubr.msk.f32.mxu1 %vm94_vm1, %v52_v18  ;;  %v61_v45 = vld [vmem:[%s3741_s0 + $0x148] sm:$0xff]  ;;  %v40_v46 = vld [vmem:[%s3741_s0 + $0xa0] sm:$0xff]  ;;  %v62_v47 = vld [vmem:[%s3741_s0 + $0x150] sm:$0xff] }
  0x10   :  { %2241 = vmatmul.mubr.msk.f32.gmra.mrb[6].mxu0 %vm94_vm1, %v27_v11  ;;  %2495 = vmatpush3.bf16.msra.mxu1 %v2492_v28  ;;  %v41_v48 = vld [vmem:[%s3741_s0 + $0xa8] sm:$0xff]  ;;  %v63_v49 = vld [vmem:[%s3741_s0 + $0x158] sm:$0xff]  ;;  %v42_v50 = vld [vmem:[%s3741_s0 + $0xb0] sm:$0xff] }
  0x11   :  { %2243 = vmatprep.mubr.msk.f32.mxu0 %vm94_vm1, %v28_v13  ;;  %2497 = vmatprep.subr.bf16.mxu1 %v2496_v35  ;;  %v64_v51 = vld [vmem:[%s3741_s0 + $0x160] sm:$0xff]  ;;  %v43_v52 = vld [vmem:[%s3741_s0 + $0xb8] sm:$0xff]  ;;  %v65_v53 = vld [vmem:[%s3741_s0 + $0x168] sm:$0xff] }
  0x12   :  { %2280 = vmatmul.mubr.msk.f32.gmra.mrb[6].mxu1 %vm94_vm1, %v53_v25  ;;  %v44_v54 = vld [vmem:[%s3741_s0 + $0xc0] sm:$0xff]  ;;  %v66_v55 = vld [vmem:[%s3741_s0 + $0x170] sm:$0xff]  ;;  %v45_v56 = vld [vmem:[%s3741_s0 + $0xc8] sm:$0xff] }
  0x13   :  { %2282 = vmatprep.mubr.msk.f32.mxu1 %vm94_vm1, %v54_v27  ;;  %v67_v57 = vld [vmem:[%s3741_s0 + $0x178] sm:$0xff]  ;;  %v68_v58 = vld [vmem:[%s3741_s0 + $0x180] sm:$0xff]  ;;  %v69_v59 = vld [vmem:[%s3741_s0 + $0x188] sm:$0xff] }
  0x14   :  { %2244 = vmatmul.mubr.msk.f32.gmra.mrb[8].mxu0 %vm94_vm1, %v29_v15  ;;  %2499 = vmatpush3.bf16.msra.mxu1 %v2496_v35  ;;  %v77_v60 = vld [vmem:[%s3742_s2 + $0x30] sm:$0xff]  ;;  %v78_v61 = vld [vmem:[%s3742_s2 + $0x38] sm:$0xff]  ;;  %v79_v63 = vld [vmem:[%s3743_s3] sm:$0xff] }
  0x15   :  { %2246 = vmatprep.mubr.msk.f32.mxu0 %vm94_vm1, %v30_v16  ;;  %v2500_v62 = vpack.c.bf16 %v78_v61, %v77_v60  ;;  %v80_v0 = vld [vmem:[%s3743_s3 + $0x8] sm:$0xff]  ;;  %v81_v1 = vld [vmem:[%s3743_s3 + $0x10] sm:$0xff]  ;;  %v82_v3 = vld [vmem:[%s3743_s3 + $0x18] sm:$0xff] }
  0x16   :  { %2283 = vmatmul.mubr.msk.f32.gmra.mrb[8].mxu1 %vm94_vm1, %v55_v32  ;;  %v2504_v2 = vpack.c.bf16 %v80_v0, %v79_v63  ;;  %v2508_v4 = vpack.c.bf16 %v82_v3, %v81_v1  ;;  %v83_v5 = vld [vmem:[%s3743_s3 + $0x20] sm:$0xff]  ;;  %v84_v6 = vld [vmem:[%s3743_s3 + $0x28] sm:$0xff] }
  0x17   :  { %2285 = vmatprep.mubr.msk.f32.mxu1 %vm94_vm1, %v56_v34  ;;  %2501 = vmatprep.subr.bf16.mxu1 %v2500_v62  ;;  %v2512_v7 = vpack.c.bf16 %v84_v6, %v83_v5  ;;  %v3200_v8 = vld [vmem:[%s3744_s4] ss:$0 sm:$0xff] }
  0x18   :  { %2247 = vmatmul.mubr.msk.f32.gmra.mrb[10].mxu0 %vm94_vm1, %v31_v24  ;;  %2503 = vmatpush3.bf16.msra.mxu1 %v2500_v62 }
  0x19   :  { %2249 = vmatprep.mubr.msk.f32.mxu0 %vm94_vm1, %v32_v26  ;;  %2505 = vmatprep.subr.bf16.mxu0 %v2504_v2 }
  0x1a   :  { %2286 = vmatmul.mubr.msk.f32.gmra.mrb[10].mxu1 %vm94_vm1, %v57_v37  ;;  %2507 = vmatpush3.bf16.msra.mxu0 %v2504_v2 }
  0x1b   :  { %2288 = vmatprep.mubr.msk.f32.mxu1 %vm94_vm1, %v58_v39  ;;  %2509 = vmatprep.subr.bf16.mxu0 %v2508_v4 }
  0x1c   :  { %2250 = vmatmul.mubr.msk.f32.gmra.mrb[12].mxu0 %vm94_vm1, %v33_v31 }
  0x1d   :  { %2252 = vmatprep.mubr.msk.f32.mxu0 %vm94_vm1, %v34_v33 }
  0x1e   :  { %2289 = vmatmul.mubr.msk.f32.gmra.mrb[12].mxu1 %vm94_vm1, %v59_v41  ;;  %2511 = vmatpush3.bf16.msra.mxu0 %v2508_v4 }
  0x1f   :  { %2291 = vmatprep.mubr.msk.f32.mxu1 %vm94_vm1, %v60_v43  ;;  %2513 = vmatprep.subr.bf16.mxu0 %v2512_v7 }
  0x20   :  { %2253 = vmatmul.mubr.msk.f32.gmra.mrb[14].mxu0 %vm94_vm1, %v35_v36 }
  0x21   :  { %2255 = vmatprep.mubr.msk.f32.mxu0 %vm94_vm1, %v36_v38 }
  0x22   :  { %2292 = vmatmul.mubr.msk.f32.gmra.mrb[14].mxu1 %vm94_vm1, %v61_v45  ;;  %2515 = vmatpush3.bf16.msra.mxu0 %v2512_v7 }
  0x23   :  { %2294 = vmatprep.mubr.msk.f32.mxu1 %vm94_vm1, %v62_v47 }
  0x24   :  { %2256 = vmatmul.mubr.msk.f32.gmra.mrb[16].mxu0 %vm94_vm1, %v37_v40 }
  0x25   :  { %2258 = vmatprep.mubr.msk.f32.mxu0 %vm94_vm1, %v38_v42 }
  0x26   :  { %2295 = vmatmul.mubr.msk.f32.gmra.mrb[16].mxu1 %vm94_vm1, %v63_v49 }
  0x27   :  { %2297 = vmatprep.mubr.msk.f32.mxu1 %vm94_vm1, %v64_v51 }
  0x28   :  { %2259 = vmatmul.mubr.msk.f32.gmra.mrb[18].mxu0 %vm94_vm1, %v39_v44 }
  0x29   :  { %2261 = vmatprep.mubr.msk.f32.mxu0 %vm94_vm1, %v40_v46 }
  0x2a   :  { %2298 = vmatmul.mubr.msk.f32.gmra.mrb[18].mxu1 %vm94_vm1, %v65_v53 }
  0x2b   :  { %2300 = vmatprep.mubr.msk.f32.mxu1 %vm94_vm1, %v66_v55 }
  0x2c   :  { %2262 = vmatmul.mubr.msk.f32.gmra.mrb[20].mxu0 %vm94_vm1, %v41_v48 }
  0x2d   :  { %2264 = vmatprep.mubr.msk.f32.mxu0 %vm94_vm1, %v42_v50 }
  0x2e   :  { %2301 = vmatmul.mubr.msk.f32.gmra.mrb[20].mxu1 %vm94_vm1, %v67_v57 }
  0x2f   :  { %2303 = vmatprep.mubr.msk.f32.mxu1 %vm94_vm1, %v68_v58 }
  0x30   :  { %2265 = vmatmul.mubr.msk.f32.gmra.mrb[22].mxu0 %vm94_vm1, %v43_v52 }
  0x31   :  { %2267 = vmatprep.mubr.msk.f32.mxu0 %vm94_vm1, %v44_v54 }
  0x32   :  { %2304 = vmatmul.mubr.msk.f32.gmra.mrb[22].mxu1 %vm94_vm1, %v69_v59 }
  0x34   :  { %2268 = vmatmul.mubr.msk.f32.gmra.mrb[24].mxu0 %vm94_vm1, %v45_v56 }
  0xd7   :  { %v2233_v9 = vpop.f32.mrb[0].mxu0 }
  0xd8   :  { %v321_v10 = vadd.f32 %v2233_v9, %v3200_v8  ;;  %v315_v11 = vpop.f32.mrb[1].mxu0 }
  0xd9   :  { %v316_v12 = vadd.f32 %v3200_v8, %v315_v11  ;;  %v3206_v18 = vpop.f32.mrb[0].mxu1 }
  0xda   :  { %v3209_v21 = vpop.f32.mrb[1].mxu1 }
  0xdb   :  { %2522 = vtanh.f32 %v316_v12  ;;  %v2236_v13 = vpop.f32.mrb[2].mxu0 }
  0xdc   :  { %2524 = vtanh.f32 %v321_v10  ;;  %v331_v14 = vadd.f32 %v2236_v13, %v3200_v8  ;;  %v325_v15 = vpop.f32.mrb[3].mxu0 }
  0xdd   :  { %v326_v16 = vadd.f32 %v3200_v8, %v325_v15  ;;  %v3212_v24 = vpop.f32.mrb[2].mxu1 }
  0xde   :  { %v3215_v27 = vpop.f32.mrb[3].mxu1 }
  0xdf   :  { %2526 = vtanh.f32 %v326_v16  ;;  %v2239_v17 = vpop.f32.mrb[4].mxu0 }
  0xe0   :  { %2528 = vtanh.f32 %v331_v14  ;;  %v341_v19 = vadd.f32 %v2239_v17, %v3200_v8  ;;  %v335_v20 = vpop.f32.mrb[5].mxu0 }
  0xe1   :  { %v336_v22 = vadd.f32 %v3200_v8, %v335_v20  ;;  %v3220_v32 = vpop.f32.mrb[4].mxu1 }
  0xe2   :  { %v3223_v35 = vpop.f32.mrb[5].mxu1 }
  0xe3   :  { %2530 = vtanh.f32 %v336_v22  ;;  %v2242_v23 = vpop.f32.mrb[6].mxu0 }
  0xe4   :  { %2532 = vtanh.f32 %v341_v19  ;;  %v351_v25 = vadd.f32 %v2242_v23, %v3200_v8  ;;  %v345_v26 = vpop.f32.mrb[7].mxu0 }
  0xe5   :  { %v2523_v28 = vpop.eup %2522  ;;  %v346_v29 = vadd.f32 %v3200_v8, %v345_v26  ;;  %v2281_v40 = vpop.f32.mrb[6].mxu1 }
  0xe6   :  { %v2525_v30 = vpop.eup %2524  ;;  %2322 = vmatprep.mubr.msk.f32.mxu1 %vm618_vm2, %v2523_v28  ;;  %v3230_v43 = vadd.f32 %v2281_v40, %v3200_v8  ;;  %v3232_v44 = vpop.f32.mrb[7].mxu1 }
  0xe7   :  { %2534 = vtanh.f32 %v346_v29  ;;  %v2245_v31 = vpop.f32.mrb[8].mxu0  ;;  %2323 = vmatmul.mubr.msk.f32.vlgmr.msra.gmra.mrb[24].mxu1 %vm618_vm2, %v2525_v30 }
  0xe8   :  { %2536 = vtanh.f32 %v351_v25  ;;  %v361_v33 = vadd.f32 %v2245_v31, %v3200_v8  ;;  %v355_v34 = vpop.f32.mrb[9].mxu0 }
  0xe9   :  { %v2527_v36 = vpop.eup %2526  ;;  %v356_v37 = vadd.f32 %v3200_v8, %v355_v34  ;;  %v2284_v49 = vpop.f32.mrb[8].mxu1 }
  0xea   :  { %v2529_v38 = vpop.eup %2528  ;;  %2325 = vmatprep.mubr.msk.f32.mxu1 %vm618_vm2, %v2527_v36  ;;  %v3239_v52 = vadd.f32 %v2284_v49, %v3200_v8  ;;  %v485_v53 = vpop.f32.mrb[9].mxu1 }
  0xeb   :  { %2538 = vtanh.f32 %v356_v37  ;;  %v2248_v39 = vpop.f32.mrb[10].mxu0  ;;  %2326 = vmatmul.mubr.msk.f32.gmra.mrb[26].mxu1 %vm618_vm2, %v2529_v38  ;;  %v3243_v56 = vadd.f32 %v3200_v8, %v485_v53 }
  0xec   :  { %2540 = vtanh.f32 %v361_v33  ;;  %v371_v41 = vadd.f32 %v2248_v39, %v3200_v8  ;;  %v365_v42 = vpop.f32.mrb[11].mxu0 }
  0xed   :  { %v2531_v45 = vpop.eup %2530  ;;  %v366_v46 = vadd.f32 %v3200_v8, %v365_v42  ;;  %v2287_v59 = vpop.f32.mrb[10].mxu1 }
  0xee   :  { %v2533_v47 = vpop.eup %2532  ;;  %2328 = vmatprep.mubr.msk.f32.mxu1 %vm618_vm2, %v2531_v45  ;;  %v3249_v62 = vadd.f32 %v2287_v59, %v3200_v8  ;;  %v495_v63 = vpop.f32.mrb[11].mxu1 }
  0xef   :  { %2542 = vtanh.f32 %v366_v46  ;;  %v2251_v48 = vpop.f32.mrb[12].mxu0  ;;  %2329 = vmatmul.mubr.msk.f32.gmra.mrb[28].mxu1 %vm618_vm2, %v2533_v47  ;;  %v3253_v2 = vadd.f32 %v3200_v8, %v495_v63 }
  0xf0   :  { %2544 = vtanh.f32 %v371_v41  ;;  %v381_v50 = vadd.f32 %v2251_v48, %v3200_v8  ;;  %v375_v51 = vpop.f32.mrb[13].mxu0 }
  0xf1   :  { %v2535_v54 = vpop.eup %2534  ;;  %v376_v55 = vadd.f32 %v3200_v8, %v375_v51  ;;  %v2290_v5 = vpop.f32.mrb[12].mxu1 }
  0xf2   :  { %v2537_v57 = vpop.eup %2536  ;;  %2331 = vmatprep.mubr.msk.f32.mxu1 %vm618_vm2, %v2535_v54  ;;  %v3259_v9 = vadd.f32 %v2290_v5, %v3200_v8  ;;  %v505_v10 = vpop.f32.mrb[13].mxu1  ;;  %v446_v54 = vadd.f32 %v3200_v8, %v3209_v21  ;;  %v451_v5 = vadd.f32 %v3206_v18, %v3200_v8  ;;  %v461_v18 = vadd.f32 %v3212_v24, %v3200_v8 }
  0xf3   :  { %2546 = vtanh.f32 %v376_v55  ;;  %v2254_v58 = vpop.f32.mrb[14].mxu0  ;;  %2332 = vmatmul.mubr.msk.f32.gmra.mrb[30].mxu1 %vm618_vm2, %v2537_v57  ;;  %v3263_v13 = vadd.f32 %v3200_v8, %v505_v10 }
  0xf4   :  { %2548 = vtanh.f32 %v381_v50  ;;  %v391_v60 = vadd.f32 %v2254_v58, %v3200_v8  ;;  %v385_v61 = vpop.f32.mrb[15].mxu0 }
  0xf5   :  { %v2539_v0 = vpop.eup %2538  ;;  %v386_v1 = vadd.f32 %v3200_v8, %v385_v61  ;;  %v2293_v16 = vpop.f32.mrb[14].mxu1 }
  0xf6   :  { %v2541_v3 = vpop.eup %2540  ;;  %2334 = vmatprep.mubr.msk.f32.mxu1 %vm618_vm2, %v2539_v0  ;;  %v3269_v20 = vadd.f32 %v2293_v16, %v3200_v8  ;;  %v515_v22 = vpop.f32.mrb[15].mxu1  ;;  %v476_v16 = vadd.f32 %v3200_v8, %v3232_v44 }
  0xf7   :  { %2550 = vtanh.f32 %v386_v1  ;;  %v2257_v4 = vpop.f32.mrb[16].mxu0  ;;  %2335 = vmatmul.mubr.msk.f32.gmra.mrb[32].mxu1 %vm618_vm2, %v2541_v3  ;;  %v3273_v26 = vadd.f32 %v3200_v8, %v515_v22  ;;  %v456_v3 = vadd.f32 %v3200_v8, %v3215_v27  ;;  %v466_v27 = vadd.f32 %v3200_v8, %v3223_v35 }
  0xf8   :  { %2552 = vtanh.f32 %v391_v60  ;;  %v401_v6 = vadd.f32 %v2257_v4, %v3200_v8  ;;  %v395_v7 = vpop.f32.mrb[17].mxu0 }
  0xf9   :  { %v2543_v11 = vpop.eup %2542  ;;  %v396_v12 = vadd.f32 %v3200_v8, %v395_v7  ;;  %v2296_v30 = vpop.f32.mrb[16].mxu1 }
  0xfa   :  { %v2545_v14 = vpop.eup %2544  ;;  %2337 = vmatprep.mubr.msk.f32.mxu1 %vm618_vm2, %v2543_v11  ;;  %v3279_v34 = vadd.f32 %v2296_v30, %v3200_v8  ;;  %v525_v36 = vpop.f32.mrb[17].mxu1 }
  0xfb   :  { %2554 = vtanh.f32 %v396_v12  ;;  %v2260_v15 = vpop.f32.mrb[18].mxu0  ;;  %2338 = vmatmul.mubr.msk.f32.gmra.mrb[34].mxu1 %vm618_vm2, %v2545_v14  ;;  %v3283_v39 = vadd.f32 %v3200_v8, %v525_v36  ;;  %v86_v36 = vld [vmem:[%s3743_s3 + $0x38] sm:$0xff] }
  0xfc   :  { %2556 = vtanh.f32 %v401_v6  ;;  %v411_v17 = vadd.f32 %v2260_v15, %v3200_v8  ;;  %v405_v19 = vpop.f32.mrb[19].mxu0 }
  0xfd   :  { %v2547_v23 = vpop.eup %2546  ;;  %v406_v25 = vadd.f32 %v3200_v8, %v405_v19  ;;  %v2299_v42 = vpop.f32.mrb[18].mxu1  ;;  %v471_v19 = vadd.f32 %v3220_v32, %v3200_v8 }
  0xfe   :  { %v2549_v28 = vpop.eup %2548  ;;  %2340 = vmatprep.mubr.msk.f32.mxu1 %vm618_vm2, %v2547_v23  ;;  %v3289_v47 = vadd.f32 %v2299_v42, %v3200_v8  ;;  %v535_v48 = vpop.f32.mrb[19].mxu1 }
  0xff   :  { %2558 = vtanh.f32 %v406_v25  ;;  %v2263_v29 = vpop.f32.mrb[20].mxu0  ;;  %2341 = vmatmul.mubr.msk.f32.gmra.mrb[36].mxu1 %vm618_vm2, %v2549_v28  ;;  %v3293_v51 = vadd.f32 %v3200_v8, %v535_v48 }
 0x100   :  { %2560 = vtanh.f32 %v411_v17  ;;  %v421_v31 = vadd.f32 %v2263_v29, %v3200_v8  ;;  %v415_v33 = vpop.f32.mrb[21].mxu0 }
 0x101   :  { %v2551_v37 = vpop.eup %2550  ;;  %v416_v38 = vadd.f32 %v3200_v8, %v415_v33  ;;  %v2302_v57 = vpop.f32.mrb[20].mxu1 }
 0x102   :  { %v2553_v40 = vpop.eup %2552  ;;  %2343 = vmatprep.mubr.msk.f32.mxu1 %vm618_vm2, %v2551_v37  ;;  %v3301_v60 = vadd.f32 %v2302_v57, %v3200_v8  ;;  %v545_v61 = vpop.f32.mrb[21].mxu1 }
 0x103   :  { %2562 = vtanh.f32 %v416_v38  ;;  %v2266_v41 = vpop.f32.mrb[22].mxu0  ;;  %2344 = vmatmul.mubr.msk.f32.gmra.mrb[38].mxu1 %vm618_vm2, %v2553_v40  ;;  %v3305_v1 = vadd.f32 %v3200_v8, %v545_v61 }
 0x104   :  { %2564 = vtanh.f32 %v421_v31  ;;  %v431_v45 = vadd.f32 %v2266_v41, %v3200_v8  ;;  %v425_v46 = vpop.f32.mrb[23].mxu0  ;;  %v3383_v41 = vld [vmem:[%s3744_s4 + $0x1] ss:$0 sm:$0xff] }
 0x105   :  { %v2555_v49 = vpop.eup %2554  ;;  %v426_v50 = vadd.f32 %v3200_v8, %v425_v46  ;;  %v2305_v4 = vpop.f32.mrb[22].mxu1 }
 0x106   :  { %v2557_v53 = vpop.eup %2556  ;;  %2346 = vmatprep.mubr.msk.f32.mxu1 %vm618_vm2, %v2555_v49  ;;  %v3314_v6 = vadd.f32 %v2305_v4, %v3200_v8  ;;  %v555_v7 = vpop.f32.mrb[23].mxu1 }
 0x107   :  { %2566 = vtanh.f32 %v426_v50  ;;  %v2269_v55 = vpop.f32.mrb[24].mxu0  ;;  %2347 = vmatmul.mubr.msk.f32.gmra.mrb[40].mxu1 %vm618_vm2, %v2557_v53  ;;  %v3317_v11 = vadd.f32 %v3200_v8, %v555_v7 }
 0x108   :  { %2568 = vtanh.f32 %v431_v45  ;;  %v441_v58 = vadd.f32 %v2269_v55, %v3200_v8  ;;  %v435_v59 = vpop.f32.mrb[25].mxu0 }
 0x109   :  { %v2559_v63 = vpop.eup %2558  ;;  %v436_v0 = vadd.f32 %v3200_v8, %v435_v59  ;;  %2570 = vtanh.f32 %v446_v54 }
 0x10a   :  { %v2561_v21 = vpop.eup %2560  ;;  %2349 = vmatprep.mubr.msk.f32.mxu1 %vm618_vm2, %v2559_v63 }
 0x10b   :  { %2572 = vtanh.f32 %v436_v0  ;;  %2350 = vmatmul.mubr.msk.f32.gmra.mrb[42].mxu1 %vm618_vm2, %v2561_v21 }
 0x10c   :  { %2574 = vtanh.f32 %v441_v58 }
 0x10d   :  { %v2563_v10 = vpop.eup %2562  ;;  %2576 = vtanh.f32 %v456_v3 }
 0x10e   :  { %v2565_v12 = vpop.eup %2564  ;;  %2352 = vmatprep.mubr.msk.f32.mxu1 %vm618_vm2, %v2563_v10  ;;  %2578 = vtanh.f32 %v451_v5 }
 0x10f   :  { %2353 = vmatmul.mubr.msk.f32.gmra.mrb[44].mxu1 %vm618_vm2, %v2565_v12  ;;  %2580 = vtanh.f32 %v466_v27 }
 0x110   :  { %2582 = vtanh.f32 %v461_v18 }
 0x111   :  { %v2567_v14 = vpop.eup %2566  ;;  %2584 = vtanh.f32 %v476_v16 }
 0x112   :  { %v2569_v15 = vpop.eup %2568  ;;  %2355 = vmatprep.mubr.msk.f32.mxu1 %vm618_vm2, %v2567_v14  ;;  %2586 = vtanh.f32 %v471_v19 }
 0x113   :  { %2356 = vmatmul.mubr.msk.f32.gmra.mrb[46].mxu1 %vm618_vm2, %v2569_v15  ;;  %v2571_v17 = vpop.eup %2570  ;;  %2588 = vtanh.f32 %v3243_v56 }
 0x114   :  { %2590 = vtanh.f32 %v3230_v43 }
 0x115   :  { %v2573_v35 = vpop.eup %2572  ;;  %2592 = vtanh.f32 %v3253_v2 }
 0x116   :  { %v2575_v22 = vpop.eup %2574  ;;  %2358 = vmatprep.mubr.msk.f32.mxu1 %vm618_vm2, %v2573_v35  ;;  %2594 = vtanh.f32 %v3239_v52 }
 0x117   :  { %2359 = vmatmul.mubr.msk.f32.gmra.mrb[48].mxu1 %vm618_vm2, %v2575_v22  ;;  %v2577_v24 = vpop.eup %2576  ;;  %2596 = vtanh.f32 %v3263_v13 }
 0x118   :  { %2361 = vmatprep.mubr.msk.f32.mxu1 %vm618_vm2, %v2571_v17  ;;  %v2579_v23 = vpop.eup %2578  ;;  %2598 = vtanh.f32 %v3249_v62 }
 0x119   :  { %v2581_v8 = vpop.eup %2580  ;;  %2600 = vtanh.f32 %v3273_v26 }
 0x11a   :  { %v2583_v32 = vpop.eup %2582  ;;  %2602 = vtanh.f32 %v3259_v9 }
 0x11b   :  { %2362 = vmatmul.mubr.msk.f32.gmra.mrb[50].mxu1 %vm618_vm2, %v2579_v23  ;;  %v2585_v44 = vpop.eup %2584  ;;  %2604 = vtanh.f32 %v3283_v39 }
 0x11c   :  { %2364 = vmatprep.mubr.msk.f32.mxu1 %vm618_vm2, %v2577_v24  ;;  %v2587_v25 = vpop.eup %2586  ;;  %2606 = vtanh.f32 %v3269_v20 }
 0x11d   :  { %v2589_v43 = vpop.eup %2588  ;;  %2608 = vtanh.f32 %v3293_v51 }
 0x11e   :  { %v2591_v56 = vpop.eup %2590  ;;  %2610 = vtanh.f32 %v3279_v34  ;;  %v85_v34 = vld [vmem:[%s3743_s3 + $0x30] sm:$0xff] }
 0x11f   :  { %2365 = vmatmul.mubr.msk.f32.gmra.mrb[52].mxu1 %vm618_vm2, %v2583_v32  ;;  %v2593_v52 = vpop.eup %2592  ;;  %2612 = vtanh.f32 %v3305_v1  ;;  %v2516_v37 = vpack.c.bf16 %v86_v36, %v85_v34 }
 0x120   :  { %2367 = vmatprep.mubr.msk.f32.mxu1 %vm618_vm2, %v2581_v8  ;;  %v2595_v2 = vpop.eup %2594  ;;  %2614 = vtanh.f32 %v3289_v47 }
 0x121   :  { %v2597_v62 = vpop.eup %2596  ;;  %2616 = vtanh.f32 %v3317_v11  ;;  %2517 = vmatprep.subr.bf16.mxu0 %v2516_v37 }
 0x122   :  { %v2599_v13 = vpop.eup %2598  ;;  %2618 = vtanh.f32 %v3301_v60  ;;  %2519 = vmatpush3.bf16.msra.mxu0 %v2516_v37 }
 0x123   :  { %2368 = vmatmul.mubr.msk.f32.gmra.mrb[54].mxu1 %vm618_vm2, %v2587_v25  ;;  %v2601_v9 = vpop.eup %2600  ;;  %2620 = vtanh.f32 %v3314_v6 }
 0x124   :  { %2370 = vmatprep.mubr.msk.f32.mxu1 %vm618_vm2, %v2585_v44  ;;  %v2603_v26 = vpop.eup %2602 }
 0x125   :  { %v2605_v20 = vpop.eup %2604 }
 0x126   :  { %v2607_v28 = vpop.eup %2606 }
 0x127   :  { %2371 = vmatmul.mubr.msk.f32.gmra.mrb[56].mxu1 %vm618_vm2, %v2591_v56  ;;  %v2609_v29 = vpop.eup %2608 }
 0x128   :  { %2373 = vmatprep.mubr.msk.f32.mxu1 %vm618_vm2, %v2589_v43  ;;  %v2611_v30 = vpop.eup %2610 }
 0x129   :  { %v2613_v31 = vpop.eup %2612 }
 0x12a   :  { %v2615_v33 = vpop.eup %2614 }
 0x12b   :  { %2374 = vmatmul.mubr.msk.f32.gmra.mrb[58].mxu1 %vm618_vm2, %v2595_v2  ;;  %v2617_v38 = vpop.eup %2616 }
 0x12c   :  { %2376 = vmatprep.mubr.msk.f32.mxu1 %vm618_vm2, %v2593_v52  ;;  %v2619_v39 = vpop.eup %2618 }
 0x12d   :  { %v2621_v40 = vpop.eup %2620 }
 0x12f   :  { %2377 = vmatmul.mubr.msk.f32.gmra.mrb[60].mxu1 %vm618_vm2, %v2599_v13 }
 0x130   :  { %2379 = vmatprep.mubr.msk.f32.mxu1 %vm618_vm2, %v2597_v62 }
 0x133   :  { %2380 = vmatmul.mubr.msk.f32.gmra.mrb[62].mxu1 %vm618_vm2, %v2603_v26 }
 0x134   :  { %2382 = vmatprep.mubr.msk.f32.mxu1 %vm618_vm2, %v2601_v9 }
 0x137   :  { %2383 = vmatmul.mubr.msk.f32.gmra.mrb[64].mxu1 %vm618_vm2, %v2607_v28 }
 0x138   :  { %2385 = vmatprep.mubr.msk.f32.mxu1 %vm618_vm2, %v2605_v20 }
 0x13b   :  { %2386 = vmatmul.mubr.msk.f32.gmra.mrb[66].mxu1 %vm618_vm2, %v2611_v30 }
 0x13c   :  { %2388 = vmatprep.mubr.msk.f32.mxu1 %vm618_vm2, %v2609_v29 }
 0x13f   :  { %2389 = vmatmul.mubr.msk.f32.gmra.mrb[68].mxu1 %vm618_vm2, %v2615_v33 }
 0x140   :  { %2391 = vmatprep.mubr.msk.f32.mxu1 %vm618_vm2, %v2613_v31 }
 0x143   :  { %2392 = vmatmul.mubr.msk.f32.gmra.mrb[70].mxu1 %vm618_vm2, %v2619_v39 }
 0x144   :  { %2394 = vmatprep.mubr.msk.f32.mxu1 %vm618_vm2, %v2617_v38 }
 0x147   :  { %2395 = vmatmul.mubr.msk.f32.gmra.mrb[72].mxu1 %vm618_vm2, %v2621_v40 }
 0x1ba   :  { %v2324_v42 = vpop.f32.mrb[24].mxu1 }
 0x1bb   :  { %v841_v45 = vadd.f32 %v2324_v42, %v3383_v41  ;;  %v835_v46 = vpop.f32.mrb[25].mxu1 }
 0x1bc   :  { %v836_v47 = vadd.f32 %v3383_v41, %v835_v46 }
 0x1be   :  { %2622 = vtanh.f32 %v836_v47  ;;  %v2327_v48 = vpop.f32.mrb[26].mxu1 }
 0x1bf   :  { %2624 = vtanh.f32 %v841_v45  ;;  %v851_v49 = vadd.f32 %v2327_v48, %v3383_v41  ;;  %v845_v50 = vpop.f32.mrb[27].mxu1 }
 0x1c0   :  { %v846_v51 = vadd.f32 %v3383_v41, %v845_v50 }
 0x1c2   :  { %2626 = vtanh.f32 %v846_v51  ;;  %v2330_v53 = vpop.f32.mrb[28].mxu1 }
 0x1c3   :  { %2628 = vtanh.f32 %v851_v49  ;;  %v861_v54 = vadd.f32 %v2330_v53, %v3383_v41  ;;  %v855_v55 = vpop.f32.mrb[29].mxu1 }
 0x1c4   :  { %v856_v57 = vadd.f32 %v3383_v41, %v855_v55 }
 0x1c6   :  { %2630 = vtanh.f32 %v856_v57  ;;  %v2333_v58 = vpop.f32.mrb[30].mxu1 }
 0x1c7   :  { %2632 = vtanh.f32 %v861_v54  ;;  %v871_v59 = vadd.f32 %v2333_v58, %v3383_v41  ;;  %v865_v60 = vpop.f32.mrb[31].mxu1 }
 0x1c8   :  { %v2623_v61 = vpop.eup %2622  ;;  %v866_v63 = vadd.f32 %v3383_v41, %v865_v60 }
 0x1c9   :  { %v2625_v0 = vpop.eup %2624  ;;  %2413 = vmatprep.mubr.msk.f32.mxu0 %vm618_vm2, %v2623_v61 }
 0x1ca   :  { %2634 = vtanh.f32 %v866_v63  ;;  %v2336_v1 = vpop.f32.mrb[32].mxu1  ;;  %2414 = vmatmul.mubr.msk.f32.vlgmr.msra.gmra.mrb[26].mxu0 %vm618_vm2, %v2625_v0 }
 0x1cb   :  { %2636 = vtanh.f32 %v871_v59  ;;  %v881_v21 = vadd.f32 %v2336_v1, %v3383_v41  ;;  %v875_v3 = vpop.f32.mrb[33].mxu1 }
 0x1cc   :  { %v2627_v4 = vpop.eup %2626  ;;  %v876_v5 = vadd.f32 %v3383_v41, %v875_v3 }
 0x1cd   :  { %v2629_v6 = vpop.eup %2628  ;;  %2416 = vmatprep.mubr.msk.f32.mxu0 %vm618_vm2, %v2627_v4 }
 0x1ce   :  { %2638 = vtanh.f32 %v876_v5  ;;  %v2339_v7 = vpop.f32.mrb[34].mxu1  ;;  %2417 = vmatmul.mubr.msk.f32.gmra.mrb[28].mxu0 %vm618_vm2, %v2629_v6 }
 0x1cf   :  { %2640 = vtanh.f32 %v881_v21  ;;  %v891_v10 = vadd.f32 %v2339_v7, %v3383_v41  ;;  %v885_v11 = vpop.f32.mrb[35].mxu1 }
 0x1d0   :  { %v2631_v12 = vpop.eup %2630  ;;  %v886_v27 = vadd.f32 %v3383_v41, %v885_v11 }
 0x1d1   :  { %v2633_v18 = vpop.eup %2632  ;;  %2419 = vmatprep.mubr.msk.f32.mxu0 %vm618_vm2, %v2631_v12 }
 0x1d2   :  { %2642 = vtanh.f32 %v886_v27  ;;  %v2342_v14 = vpop.f32.mrb[36].mxu1  ;;  %2420 = vmatmul.mubr.msk.f32.gmra.mrb[30].mxu0 %vm618_vm2, %v2633_v18 }
 0x1d3   :  { %2644 = vtanh.f32 %v891_v10  ;;  %v901_v15 = vadd.f32 %v2342_v14, %v3383_v41  ;;  %v895_v16 = vpop.f32.mrb[37].mxu1 }
 0x1d4   :  { %v2635_v17 = vpop.eup %2634  ;;  %v896_v19 = vadd.f32 %v3383_v41, %v895_v16 }
 0x1d5   :  { %v2637_v35 = vpop.eup %2636  ;;  %2422 = vmatprep.mubr.msk.f32.mxu0 %vm618_vm2, %v2635_v17 }
 0x1d6   :  { %2646 = vtanh.f32 %v896_v19  ;;  %v2345_v22 = vpop.f32.mrb[38].mxu1  ;;  %2423 = vmatmul.mubr.msk.f32.gmra.mrb[32].mxu0 %vm618_vm2, %v2637_v35 }
 0x1d7   :  { %2648 = vtanh.f32 %v901_v15  ;;  %v911_v24 = vadd.f32 %v2345_v22, %v3383_v41  ;;  %v905_v23 = vpop.f32.mrb[39].mxu1 }
 0x1d8   :  { %v2639_v8 = vpop.eup %2638  ;;  %v906_v32 = vadd.f32 %v3383_v41, %v905_v23 }
 0x1d9   :  { %v2641_v44 = vpop.eup %2640  ;;  %2425 = vmatprep.mubr.msk.f32.mxu0 %vm618_vm2, %v2639_v8 }
 0x1da   :  { %2650 = vtanh.f32 %v906_v32  ;;  %v2348_v25 = vpop.f32.mrb[40].mxu1  ;;  %2426 = vmatmul.mubr.msk.f32.gmra.mrb[34].mxu0 %vm618_vm2, %v2641_v44 }
 0x1db   :  { %2652 = vtanh.f32 %v911_v24  ;;  %v921_v43 = vadd.f32 %v2348_v25, %v3383_v41  ;;  %v915_v56 = vpop.f32.mrb[41].mxu1 }
 0x1dc   :  { %v2643_v52 = vpop.eup %2642  ;;  %v916_v2 = vadd.f32 %v3383_v41, %v915_v56 }
 0x1dd   :  { %v2645_v62 = vpop.eup %2644  ;;  %2428 = vmatprep.mubr.msk.f32.mxu0 %vm618_vm2, %v2643_v52 }
 0x1de   :  { %2654 = vtanh.f32 %v916_v2  ;;  %v2351_v13 = vpop.f32.mrb[42].mxu1  ;;  %2429 = vmatmul.mubr.msk.f32.gmra.mrb[36].mxu0 %vm618_vm2, %v2645_v62 }
 0x1df   :  { %2656 = vtanh.f32 %v921_v43  ;;  %v931_v9 = vadd.f32 %v2351_v13, %v3383_v41  ;;  %v925_v26 = vpop.f32.mrb[43].mxu1 }
 0x1e0   :  { %v2647_v20 = vpop.eup %2646  ;;  %v926_v28 = vadd.f32 %v3383_v41, %v925_v26 }
 0x1e1   :  { %v2649_v29 = vpop.eup %2648  ;;  %2431 = vmatprep.mubr.msk.f32.mxu0 %vm618_vm2, %v2647_v20 }
 0x1e2   :  { %2658 = vtanh.f32 %v926_v28  ;;  %v2354_v30 = vpop.f32.mrb[44].mxu1  ;;  %2432 = vmatmul.mubr.msk.f32.gmra.mrb[38].mxu0 %vm618_vm2, %v2649_v29 }
 0x1e3   :  { %2660 = vtanh.f32 %v931_v9  ;;  %v941_v31 = vadd.f32 %v2354_v30, %v3383_v41  ;;  %v935_v33 = vpop.f32.mrb[45].mxu1 }
 0x1e4   :  { %v2651_v34 = vpop.eup %2650  ;;  %v936_v36 = vadd.f32 %v3383_v41, %v935_v33 }
 0x1e5   :  { %v2653_v37 = vpop.eup %2652  ;;  %2434 = vmatprep.mubr.msk.f32.mxu0 %vm618_vm2, %v2651_v34 }
 0x1e6   :  { %2662 = vtanh.f32 %v936_v36  ;;  %v2357_v38 = vpop.f32.mrb[46].mxu1  ;;  %2435 = vmatmul.mubr.msk.f32.gmra.mrb[40].mxu0 %vm618_vm2, %v2653_v37 }
 0x1e7   :  { %2664 = vtanh.f32 %v941_v31  ;;  %v951_v39 = vadd.f32 %v2357_v38, %v3383_v41  ;;  %v945_v40 = vpop.f32.mrb[47].mxu1 }
 0x1e8   :  { %v2655_v42 = vpop.eup %2654  ;;  %v946_v45 = vadd.f32 %v3383_v41, %v945_v40 }
 0x1e9   :  { %v2657_v46 = vpop.eup %2656  ;;  %2437 = vmatprep.mubr.msk.f32.mxu0 %vm618_vm2, %v2655_v42 }
 0x1ea   :  { %2666 = vtanh.f32 %v946_v45  ;;  %v2360_v47 = vpop.f32.mrb[48].mxu1  ;;  %2438 = vmatmul.mubr.msk.f32.gmra.mrb[42].mxu0 %vm618_vm2, %v2657_v46 }
 0x1eb   :  { %2668 = vtanh.f32 %v951_v39  ;;  %v961_v48 = vadd.f32 %v2360_v47, %v3383_v41  ;;  %v955_v49 = vpop.f32.mrb[49].mxu1 }
 0x1ec   :  { %v2659_v50 = vpop.eup %2658  ;;  %v956_v51 = vadd.f32 %v3383_v41, %v955_v49 }
 0x1ed   :  { %v2661_v53 = vpop.eup %2660  ;;  %2440 = vmatprep.mubr.msk.f32.mxu0 %vm618_vm2, %v2659_v50 }
 0x1ee   :  { %2670 = vtanh.f32 %v956_v51  ;;  %v2363_v54 = vpop.f32.mrb[50].mxu1  ;;  %2441 = vmatmul.mubr.msk.f32.gmra.mrb[44].mxu0 %vm618_vm2, %v2661_v53 }
 0x1ef   :  { %2672 = vtanh.f32 %v961_v48  ;;  %v971_v55 = vadd.f32 %v2363_v54, %v3383_v41  ;;  %v965_v57 = vpop.f32.mrb[51].mxu1 }
 0x1f0   :  { %v2663_v58 = vpop.eup %2662  ;;  %v966_v59 = vadd.f32 %v3383_v41, %v965_v57 }
 0x1f1   :  { %v2665_v60 = vpop.eup %2664  ;;  %2443 = vmatprep.mubr.msk.f32.mxu0 %vm618_vm2, %v2663_v58 }
 0x1f2   :  { %2674 = vtanh.f32 %v966_v59  ;;  %v2366_v61 = vpop.f32.mrb[52].mxu1  ;;  %2444 = vmatmul.mubr.msk.f32.gmra.mrb[46].mxu0 %vm618_vm2, %v2665_v60 }
 0x1f3   :  { %2676 = vtanh.f32 %v971_v55  ;;  %v981_v63 = vadd.f32 %v2366_v61, %v3383_v41  ;;  %v975_v0 = vpop.f32.mrb[53].mxu1 }
 0x1f4   :  { %v2667_v1 = vpop.eup %2666  ;;  %v976_v21 = vadd.f32 %v3383_v41, %v975_v0 }
 0x1f5   :  { %v2669_v3 = vpop.eup %2668  ;;  %2446 = vmatprep.mubr.msk.f32.mxu0 %vm618_vm2, %v2667_v1 }
 0x1f6   :  { %2678 = vtanh.f32 %v976_v21  ;;  %v2369_v4 = vpop.f32.mrb[54].mxu1  ;;  %2447 = vmatmul.mubr.msk.f32.gmra.mrb[48].mxu0 %vm618_vm2, %v2669_v3 }
 0x1f7   :  { %2680 = vtanh.f32 %v981_v63  ;;  %v991_v5 = vadd.f32 %v2369_v4, %v3383_v41  ;;  %v985_v6 = vpop.f32.mrb[55].mxu1 }
 0x1f8   :  { %v2671_v7 = vpop.eup %2670  ;;  %v986_v10 = vadd.f32 %v3383_v41, %v985_v6  ;;  %v3488_v6 = vld [vmem:[%s3744_s4 + $0x2] ss:$0 sm:$0xff] }
 0x1f9   :  { %v2673_v11 = vpop.eup %2672  ;;  %2449 = vmatprep.mubr.msk.f32.mxu0 %vm618_vm2, %v2671_v7 }
 0x1fa   :  { %2682 = vtanh.f32 %v986_v10  ;;  %v2372_v12 = vpop.f32.mrb[56].mxu1  ;;  %2450 = vmatmul.mubr.msk.f32.gmra.mrb[50].mxu0 %vm618_vm2, %v2673_v11 }
 0x1fb   :  { %2684 = vtanh.f32 %v991_v5  ;;  %v1001_v27 = vadd.f32 %v2372_v12, %v3383_v41  ;;  %v995_v18 = vpop.f32.mrb[57].mxu1 }
 0x1fc   :  { %v2675_v14 = vpop.eup %2674  ;;  %v996_v15 = vadd.f32 %v3383_v41, %v995_v18 }
 0x1fd   :  { %v2677_v16 = vpop.eup %2676  ;;  %2452 = vmatprep.mubr.msk.f32.mxu0 %vm618_vm2, %v2675_v14 }
 0x1fe   :  { %2686 = vtanh.f32 %v996_v15  ;;  %v2375_v17 = vpop.f32.mrb[58].mxu1  ;;  %2453 = vmatmul.mubr.msk.f32.gmra.mrb[52].mxu0 %vm618_vm2, %v2677_v16 }
 0x1ff   :  { %2688 = vtanh.f32 %v1001_v27  ;;  %v1011_v19 = vadd.f32 %v2375_v17, %v3383_v41  ;;  %v1005_v35 = vpop.f32.mrb[59].mxu1 }
 0x200   :  { %v2679_v22 = vpop.eup %2678  ;;  %v1006_v24 = vadd.f32 %v3383_v41, %v1005_v35 }
 0x201   :  { %v2681_v23 = vpop.eup %2680  ;;  %2455 = vmatprep.mubr.msk.f32.mxu0 %vm618_vm2, %v2679_v22 }
 0x202   :  { %2690 = vtanh.f32 %v1006_v24  ;;  %v2378_v8 = vpop.f32.mrb[60].mxu1  ;;  %2456 = vmatmul.mubr.msk.f32.gmra.mrb[54].mxu0 %vm618_vm2, %v2681_v23 }
 0x203   :  { %2692 = vtanh.f32 %v1011_v19  ;;  %v1021_v32 = vadd.f32 %v2378_v8, %v3383_v41  ;;  %v1015_v44 = vpop.f32.mrb[61].mxu1 }
 0x204   :  { %v2683_v25 = vpop.eup %2682  ;;  %v1016_v43 = vadd.f32 %v3383_v41, %v1015_v44 }
 0x205   :  { %v2685_v56 = vpop.eup %2684  ;;  %2458 = vmatprep.mubr.msk.f32.mxu0 %vm618_vm2, %v2683_v25 }
 0x206   :  { %2694 = vtanh.f32 %v1016_v43  ;;  %v2381_v52 = vpop.f32.mrb[62].mxu1  ;;  %2459 = vmatmul.mubr.msk.f32.gmra.mrb[56].mxu0 %vm618_vm2, %v2685_v56 }
 0x207   :  { %2696 = vtanh.f32 %v1021_v32  ;;  %v1031_v2 = vadd.f32 %v2381_v52, %v3383_v41  ;;  %v1025_v62 = vpop.f32.mrb[63].mxu1 }
 0x208   :  { %v2687_v13 = vpop.eup %2686  ;;  %v1026_v9 = vadd.f32 %v3383_v41, %v1025_v62 }
 0x209   :  { %v2689_v26 = vpop.eup %2688  ;;  %2461 = vmatprep.mubr.msk.f32.mxu0 %vm618_vm2, %v2687_v13 }
 0x20a   :  { %2698 = vtanh.f32 %v1026_v9  ;;  %v2384_v20 = vpop.f32.mrb[64].mxu1  ;;  %2462 = vmatmul.mubr.msk.f32.gmra.mrb[58].mxu0 %vm618_vm2, %v2689_v26 }
 0x20b   :  { %2700 = vtanh.f32 %v1031_v2  ;;  %v1041_v28 = vadd.f32 %v2384_v20, %v3383_v41  ;;  %v1035_v29 = vpop.f32.mrb[65].mxu1 }
 0x20c   :  { %v2691_v30 = vpop.eup %2690  ;;  %v1036_v31 = vadd.f32 %v3383_v41, %v1035_v29 }
 0x20d   :  { %v2693_v33 = vpop.eup %2692  ;;  %2464 = vmatprep.mubr.msk.f32.mxu0 %vm618_vm2, %v2691_v30 }
 0x20e   :  { %2702 = vtanh.f32 %v1036_v31  ;;  %v2387_v34 = vpop.f32.mrb[66].mxu1  ;;  %2465 = vmatmul.mubr.msk.f32.gmra.mrb[60].mxu0 %vm618_vm2, %v2693_v33 }
 0x20f   :  { %2704 = vtanh.f32 %v1041_v28  ;;  %v1051_v36 = vadd.f32 %v2387_v34, %v3383_v41  ;;  %v1045_v37 = vpop.f32.mrb[67].mxu1 }
 0x210   :  { %v2695_v38 = vpop.eup %2694  ;;  %v1046_v39 = vadd.f32 %v3383_v41, %v1045_v37 }
 0x211   :  { %v2697_v40 = vpop.eup %2696  ;;  %2467 = vmatprep.mubr.msk.f32.mxu0 %vm618_vm2, %v2695_v38 }
 0x212   :  { %2706 = vtanh.f32 %v1046_v39  ;;  %v2390_v42 = vpop.f32.mrb[68].mxu1  ;;  %2468 = vmatmul.mubr.msk.f32.gmra.mrb[62].mxu0 %vm618_vm2, %v2697_v40 }
 0x213   :  { %2708 = vtanh.f32 %v1051_v36  ;;  %v1061_v45 = vadd.f32 %v2390_v42, %v3383_v41  ;;  %v1055_v46 = vpop.f32.mrb[69].mxu1 }
 0x214   :  { %v2699_v47 = vpop.eup %2698  ;;  %v1056_v48 = vadd.f32 %v3383_v41, %v1055_v46 }
 0x215   :  { %v2701_v49 = vpop.eup %2700  ;;  %2470 = vmatprep.mubr.msk.f32.mxu0 %vm618_vm2, %v2699_v47 }
 0x216   :  { %2710 = vtanh.f32 %v1056_v48  ;;  %v2393_v50 = vpop.f32.mrb[70].mxu1  ;;  %2471 = vmatmul.mubr.msk.f32.gmra.mrb[64].mxu0 %vm618_vm2, %v2701_v49 }
 0x217   :  { %2712 = vtanh.f32 %v1061_v45  ;;  %v1071_v51 = vadd.f32 %v2393_v50, %v3383_v41  ;;  %v1065_v53 = vpop.f32.mrb[71].mxu1 }
 0x218   :  { %v2703_v54 = vpop.eup %2702  ;;  %v1066_v55 = vadd.f32 %v3383_v41, %v1065_v53 }
 0x219   :  { %v2705_v57 = vpop.eup %2704  ;;  %2473 = vmatprep.mubr.msk.f32.mxu0 %vm618_vm2, %v2703_v54 }
 0x21a   :  { %2714 = vtanh.f32 %v1066_v55  ;;  %v2396_v58 = vpop.f32.mrb[72].mxu1  ;;  %2474 = vmatmul.mubr.msk.f32.gmra.mrb[66].mxu0 %vm618_vm2, %v2705_v57 }
 0x21b   :  { %2716 = vtanh.f32 %v1071_v51  ;;  %v1081_v59 = vadd.f32 %v2396_v58, %v3383_v41  ;;  %v1075_v60 = vpop.f32.mrb[73].mxu1 }
 0x21c   :  { %v2707_v61 = vpop.eup %2706  ;;  %v1076_v63 = vadd.f32 %v3383_v41, %v1075_v60 }
 0x21d   :  { %v2709_v0 = vpop.eup %2708  ;;  %2476 = vmatprep.mubr.msk.f32.mxu0 %vm618_vm2, %v2707_v61 }
 0x21e   :  { %2718 = vtanh.f32 %v1076_v63  ;;  %2477 = vmatmul.mubr.msk.f32.gmra.mrb[68].mxu0 %vm618_vm2, %v2709_v0 }
 0x21f   :  { %2720 = vtanh.f32 %v1081_v59 }
 0x220   :  { %v2711_v1 = vpop.eup %2710 }
 0x221   :  { %v2713_v21 = vpop.eup %2712  ;;  %2479 = vmatprep.mubr.msk.f32.mxu0 %vm618_vm2, %v2711_v1 }
 0x222   :  { %2480 = vmatmul.mubr.msk.f32.gmra.mrb[70].mxu0 %vm618_vm2, %v2713_v21 }
 0x224   :  { %v2715_v3 = vpop.eup %2714 }
 0x225   :  { %v2717_v4 = vpop.eup %2716  ;;  %2482 = vmatprep.mubr.msk.f32.mxu0 %vm618_vm2, %v2715_v3 }
 0x226   :  { %2483 = vmatmul.mubr.msk.f32.gmra.mrb[72].mxu0 %vm618_vm2, %v2717_v4 }
 0x228   :  { %v2719_v41 = vpop.eup %2718 }
 0x229   :  { %v2721_v5 = vpop.eup %2720  ;;  %2485 = vmatprep.mubr.msk.f32.mxu0 %vm618_vm2, %v2719_v41 }
 0x22a   :  { %2486 = vmatmul.mubr.msk.f32.gmra.mrb[74].mxu0 %vm618_vm2, %v2721_v5 }
 0x29d   :  { %v2415_v7 = vpop.f32.mrb[26].mxu0 }
 0x29e   :  { %v1360_v10 = vadd.f32 %v2415_v7, %v3488_v6  ;;  %v1354_v11 = vpop.f32.mrb[27].mxu0 }
 0x29f   :  { %v1355_v12 = vadd.f32 %v3488_v6, %v1354_v11 }
 0x2a0   :  { %v1605_v27 = vmul.f32 1.442695, %v1360_v10 }
 0x2a1   :  { %v1603_v18 = vmul.f32 1.442695, %v1355_v12  ;;  %v2418_v14 = vpop.f32.mrb[28].mxu0 }
 0x2a2   :  { %2722 = vpow2.f32 %v1605_v27  ;;  %v1370_v15 = vadd.f32 %v2418_v14, %v3488_v6  ;;  %v1364_v16 = vpop.f32.mrb[29].mxu0 }
 0x2a3   :  { %2724 = vpow2.f32 %v1603_v18  ;;  %v1365_v17 = vadd.f32 %v3488_v6, %v1364_v16 }
 0x2a4   :  { %v1609_v19 = vmul.f32 1.442695, %v1370_v15 }
 0x2a5   :  { %v1607_v35 = vmul.f32 1.442695, %v1365_v17  ;;  %v2421_v22 = vpop.f32.mrb[30].mxu0 }
 0x2a6   :  { %2726 = vpow2.f32 %v1609_v19  ;;  %v1380_v24 = vadd.f32 %v2421_v22, %v3488_v6  ;;  %v1374_v23 = vpop.f32.mrb[31].mxu0 }
 0x2a7   :  { %2728 = vpow2.f32 %v1607_v35  ;;  %v1375_v8 = vadd.f32 %v3488_v6, %v1374_v23 }
 0x2a8   :  { %v1613_v32 = vmul.f32 1.442695, %v1380_v24 }
 0x2a9   :  { %v1611_v44 = vmul.f32 1.442695, %v1375_v8  ;;  %v2424_v25 = vpop.f32.mrb[32].mxu0 }
 0x2aa   :  { %2730 = vpow2.f32 %v1613_v32  ;;  %v1390_v43 = vadd.f32 %v2424_v25, %v3488_v6  ;;  %v1384_v56 = vpop.f32.mrb[33].mxu0 }
 0x2ab   :  { %2732 = vpow2.f32 %v1611_v44  ;;  %v1385_v52 = vadd.f32 %v3488_v6, %v1384_v56 }
 0x2ac   :  { %v2723_v2 = vpop.eup %2722  ;;  %v1617_v62 = vmul.f32 1.442695, %v1390_v43 }
 0x2ad   :  { %v2725_v13 = vpop.eup %2724  ;;  %v1704_v9 = vadd.f32 1.0, %v2723_v2  ;;  %v1615_v26 = vmul.f32 1.442695, %v1385_v52  ;;  %v2427_v20 = vpop.f32.mrb[34].mxu0 }
 0x2ae   :  { %v1703_v28 = vadd.f32 1.0, %v2725_v13  ;;  %2734 = vpow2.f32 %v1617_v62  ;;  %v1400_v29 = vadd.f32 %v2427_v20, %v3488_v6  ;;  %v1394_v30 = vpop.f32.mrb[35].mxu0 }
 0x2af   :  { %2736 = vrcp.f32 %v1704_v9  ;;  %v1395_v31 = vadd.f32 %v3488_v6, %v1394_v30 }
 0x2b0   :  { %v2727_v33 = vpop.eup %2726  ;;  %2738 = vrcp.f32 %v1703_v28  ;;  %v1621_v34 = vmul.f32 1.442695, %v1400_v29 }
 0x2b1   :  { %v2729_v36 = vpop.eup %2728  ;;  %v1706_v37 = vadd.f32 1.0, %v2727_v33  ;;  %2740 = vpow2.f32 %v1615_v26  ;;  %v1619_v38 = vmul.f32 1.442695, %v1395_v31  ;;  %v2430_v39 = vpop.f32.mrb[36].mxu0 }
 0x2b2   :  { %v1705_v40 = vadd.f32 1.0, %v2729_v36  ;;  %2742 = vpow2.f32 %v1621_v34  ;;  %v1410_v42 = vadd.f32 %v2430_v39, %v3488_v6  ;;  %v1404_v45 = vpop.f32.mrb[37].mxu0 }
 0x2b3   :  { %2744 = vrcp.f32 %v1706_v37  ;;  %v1405_v46 = vadd.f32 %v3488_v6, %v1404_v45 }
 0x2b4   :  { %v2731_v47 = vpop.eup %2730  ;;  %2746 = vrcp.f32 %v1705_v40  ;;  %v1625_v48 = vmul.f32 1.442695, %v1410_v42 }
 0x2b5   :  { %v2733_v49 = vpop.eup %2732  ;;  %v1708_v50 = vadd.f32 1.0, %v2731_v47  ;;  %2748 = vpow2.f32 %v1619_v38  ;;  %v1623_v51 = vmul.f32 1.442695, %v1405_v46  ;;  %v2433_v53 = vpop.f32.mrb[38].mxu0 }
 0x2b6   :  { %v1707_v54 = vadd.f32 1.0, %v2733_v49  ;;  %2750 = vpow2.f32 %v1625_v48  ;;  %v1420_v55 = vadd.f32 %v2433_v53, %v3488_v6  ;;  %v1414_v57 = vpop.f32.mrb[39].mxu0 }
 0x2b7   :  { %2752 = vrcp.f32 %v1708_v50  ;;  %v1415_v58 = vadd.f32 %v3488_v6, %v1414_v57 }
 0x2b8   :  { %v2735_v59 = vpop.eup %2734  ;;  %2754 = vrcp.f32 %v1707_v54  ;;  %v1629_v60 = vmul.f32 1.442695, %v1420_v55 }
 0x2b9   :  { %v2737_v61 = vpop.eup %2736  ;;  %v1710_v63 = vadd.f32 1.0, %v2735_v59  ;;  %2756 = vpow2.f32 %v1623_v51  ;;  %v1627_v0 = vmul.f32 1.442695, %v1415_v58  ;;  %v2436_v1 = vpop.f32.mrb[40].mxu0 }
 0x2ba   :  { %v2739_v21 = vpop.eup %2738  ;;  %1855 = vst.msk [vmem:[%s3745_s5 + $0x8] sm:$0xff] %vm1853_vm3, %v2737_v61  ;;  %2758 = vpow2.f32 %v1629_v60  ;;  %v1430_v3 = vadd.f32 %v2436_v1, %v3488_v6  ;;  %v1424_v4 = vpop.f32.mrb[41].mxu0 }
 0x2bb   :  { %v2741_v41 = vpop.eup %2740  ;;  %1854 = vst.msk [vmem:[%s3745_s5] sm:$0xff] %vm1853_vm3, %v2739_v21  ;;  %2760 = vrcp.f32 %v1710_v63  ;;  %v1425_v5 = vadd.f32 %v3488_v6, %v1424_v4 }
 0x2bc   :  { %v2743_v7 = vpop.eup %2742  ;;  %v1709_v10 = vadd.f32 1.0, %v2741_v41  ;;  %2762 = vpow2.f32 %v1627_v0  ;;  %v1633_v11 = vmul.f32 1.442695, %v1430_v3 }
 0x2bd   :  { %v2745_v12 = vpop.eup %2744  ;;  %v1712_v27 = vadd.f32 1.0, %v2743_v7  ;;  %v1631_v18 = vmul.f32 1.442695, %v1425_v5  ;;  %v2439_v14 = vpop.f32.mrb[42].mxu0 }
 0x2be   :  { %v2747_v15 = vpop.eup %2746  ;;  %1857 = vst.msk [vmem:[%s3745_s5 + $0x18] sm:$0xff] %vm1853_vm3, %v2745_v12  ;;  %2764 = vrcp.f32 %v1709_v10  ;;  %v1440_v16 = vadd.f32 %v2439_v14, %v3488_v6  ;;  %v1434_v17 = vpop.f32.mrb[43].mxu0 }
 0x2bf   :  { %v2749_v19 = vpop.eup %2748  ;;  %1856 = vst.msk [vmem:[%s3745_s5 + $0x10] sm:$0xff] %vm1853_vm3, %v2747_v15  ;;  %2766 = vrcp.f32 %v1712_v27  ;;  %v1435_v35 = vadd.f32 %v3488_v6, %v1434_v17 }
 0x2c0   :  { %v2751_v22 = vpop.eup %2750  ;;  %v1711_v24 = vadd.f32 1.0, %v2749_v19  ;;  %2768 = vpow2.f32 %v1633_v11  ;;  %v1637_v23 = vmul.f32 1.442695, %v1440_v16 }
 0x2c1   :  { %v2753_v8 = vpop.eup %2752  ;;  %v1714_v32 = vadd.f32 1.0, %v2751_v22  ;;  %2770 = vpow2.f32 %v1631_v18  ;;  %v1635_v44 = vmul.f32 1.442695, %v1435_v35  ;;  %v2442_v25 = vpop.f32.mrb[44].mxu0 }
 0x2c2   :  { %v2755_v43 = vpop.eup %2754  ;;  %1859 = vst.msk [vmem:[%s3745_s5 + $0x28] sm:$0xff] %vm1853_vm3, %v2753_v8  ;;  %2772 = vrcp.f32 %v1711_v24  ;;  %v1450_v56 = vadd.f32 %v2442_v25, %v3488_v6  ;;  %v1444_v52 = vpop.f32.mrb[45].mxu0 }
 0x2c3   :  { %v2757_v2 = vpop.eup %2756  ;;  %1858 = vst.msk [vmem:[%s3745_s5 + $0x20] sm:$0xff] %vm1853_vm3, %v2755_v43  ;;  %2774 = vrcp.f32 %v1714_v32  ;;  %v1445_v62 = vadd.f32 %v3488_v6, %v1444_v52 }
 0x2c4   :  { %v2759_v13 = vpop.eup %2758  ;;  %v1713_v9 = vadd.f32 1.0, %v2757_v2  ;;  %2776 = vpow2.f32 %v1637_v23  ;;  %v1641_v26 = vmul.f32 1.442695, %v1450_v56 }
 0x2c5   :  { %v2761_v20 = vpop.eup %2760  ;;  %v1716_v28 = vadd.f32 1.0, %v2759_v13  ;;  %2778 = vpow2.f32 %v1635_v44  ;;  %v2445_v29 = vpop.f32.mrb[46].mxu0  ;;  %v1639_v31 = vmul.f32 1.442695, %v1445_v62 }
 0x2c6   :  { %v2763_v30 = vpop.eup %2762  ;;  %1861 = vst.msk [vmem:[%s3745_s5 + $0x38] sm:$0xff] %vm1853_vm3, %v2761_v20  ;;  %2780 = vrcp.f32 %v1713_v9  ;;  %v1460_v33 = vadd.f32 %v2445_v29, %v3488_v6  ;;  %v1454_v34 = vpop.f32.mrb[47].mxu0 }
 0x2c7   :  { %2782 = vrcp.f32 %v1716_v28  ;;  %v1715_v36 = vadd.f32 1.0, %v2763_v30  ;;  %v1455_v37 = vadd.f32 %v3488_v6, %v1454_v34 }
 0x2c8   :  { %v2765_v38 = vpop.eup %2764  ;;  %2784 = vpow2.f32 %v1641_v26  ;;  %v1645_v39 = vmul.f32 1.442695, %v1460_v33 }
 0x2c9   :  { %v2767_v40 = vpop.eup %2766  ;;  %1860 = vst.msk [vmem:[%s3745_s5 + $0x30] sm:$0xff] %vm1853_vm3, %v2765_v38  ;;  %2786 = vrcp.f32 %v1715_v36  ;;  %v1643_v42 = vmul.f32 1.442695, %v1455_v37  ;;  %v2448_v45 = vpop.f32.mrb[48].mxu0 }
 0x2ca   :  { %v2769_v46 = vpop.eup %2768  ;;  %1863 = vst.msk [vmem:[%s3745_s5 + $0x48] sm:$0xff] %vm1853_vm3, %v2767_v40  ;;  %2788 = vpow2.f32 %v1639_v31  ;;  %v1470_v47 = vadd.f32 %v2448_v45, %v3488_v6  ;;  %v1464_v48 = vpop.f32.mrb[49].mxu0 }
 0x2cb   :  { %v2771_v49 = vpop.eup %2770  ;;  %v1718_v50 = vadd.f32 1.0, %v2769_v46  ;;  %2790 = vpow2.f32 %v1645_v39  ;;  %v1465_v51 = vadd.f32 %v3488_v6, %v1464_v48 }
 0x2cc   :  { %v2773_v53 = vpop.eup %2772  ;;  %v1717_v54 = vadd.f32 1.0, %v2771_v49  ;;  %2792 = vpow2.f32 %v1643_v42  ;;  %v1649_v55 = vmul.f32 1.442695, %v1470_v47 }
 0x2cd   :  { %v2775_v57 = vpop.eup %2774  ;;  %1862 = vst.msk [vmem:[%s3745_s5 + $0x40] sm:$0xff] %vm1853_vm3, %v2773_v53  ;;  %2794 = vrcp.f32 %v1718_v50  ;;  %v1647_v58 = vmul.f32 1.442695, %v1465_v51  ;;  %v2451_v59 = vpop.f32.mrb[50].mxu0 }
 0x2ce   :  { %v2777_v60 = vpop.eup %2776  ;;  %1865 = vst.msk [vmem:[%s3745_s5 + $0x58] sm:$0xff] %vm1853_vm3, %v2775_v57  ;;  %2796 = vrcp.f32 %v1717_v54  ;;  %v1480_v61 = vadd.f32 %v2451_v59, %v3488_v6  ;;  %v1474_v63 = vpop.f32.mrb[51].mxu0 }
 0x2cf   :  { %v2779_v0 = vpop.eup %2778  ;;  %v1720_v1 = vadd.f32 1.0, %v2777_v60  ;;  %2798 = vpow2.f32 %v1649_v55  ;;  %v1475_v21 = vadd.f32 %v3488_v6, %v1474_v63 }
 0x2d0   :  { %v2781_v3 = vpop.eup %2780  ;;  %v1719_v4 = vadd.f32 1.0, %v2779_v0  ;;  %2800 = vpow2.f32 %v1647_v58  ;;  %v1653_v41 = vmul.f32 1.442695, %v1480_v61 }
 0x2d1   :  { %v2783_v5 = vpop.eup %2782  ;;  %1864 = vst.msk [vmem:[%s3745_s5 + $0x50] sm:$0xff] %vm1853_vm3, %v2781_v3  ;;  %2802 = vrcp.f32 %v1720_v1  ;;  %v1651_v7 = vmul.f32 1.442695, %v1475_v21  ;;  %v2454_v10 = vpop.f32.mrb[52].mxu0 }
 0x2d2   :  { %v2785_v11 = vpop.eup %2784  ;;  %1867 = vst.msk [vmem:[%s3745_s5 + $0x68] sm:$0xff] %vm1853_vm3, %v2783_v5  ;;  %2804 = vrcp.f32 %v1719_v4  ;;  %v1490_v12 = vadd.f32 %v2454_v10, %v3488_v6  ;;  %v1484_v27 = vpop.f32.mrb[53].mxu0 }
 0x2d3   :  { %v2787_v18 = vpop.eup %2786  ;;  %v1722_v14 = vadd.f32 1.0, %v2785_v11  ;;  %2806 = vpow2.f32 %v1653_v41  ;;  %v1485_v15 = vadd.f32 %v3488_v6, %v1484_v27 }
 0x2d4   :  { %v2789_v16 = vpop.eup %2788  ;;  %1866 = vst.msk [vmem:[%s3745_s5 + $0x60] sm:$0xff] %vm1853_vm3, %v2787_v18  ;;  %2808 = vpow2.f32 %v1651_v7  ;;  %v1657_v17 = vmul.f32 1.442695, %v1490_v12 }
 0x2d5   :  { %v2791_v19 = vpop.eup %2790  ;;  %2810 = vrcp.f32 %v1722_v14  ;;  %v1721_v35 = vadd.f32 1.0, %v2789_v16  ;;  %v2457_v22 = vpop.f32.mrb[54].mxu0  ;;  %v1655_v8 = vmul.f32 1.442695, %v1485_v15 }
 0x2d6   :  { %v2793_v24 = vpop.eup %2792  ;;  %v1724_v23 = vadd.f32 1.0, %v2791_v19  ;;  %2812 = vpow2.f32 %v1657_v17  ;;  %v1500_v32 = vadd.f32 %v2457_v22, %v3488_v6  ;;  %v1494_v44 = vpop.f32.mrb[55].mxu0 }
 0x2d7   :  { %v2795_v25 = vpop.eup %2794  ;;  %2814 = vrcp.f32 %v1721_v35  ;;  %v1723_v43 = vadd.f32 1.0, %v2793_v24  ;;  %v1495_v56 = vadd.f32 %v3488_v6, %v1494_v44 }
 0x2d8   :  { %v2797_v52 = vpop.eup %2796  ;;  %1869 = vst.msk [vmem:[%s3745_s5 + $0x78] sm:$0xff] %vm1853_vm3, %v2795_v25  ;;  %2816 = vrcp.f32 %v1724_v23  ;;  %v1661_v2 = vmul.f32 1.442695, %v1500_v32 }
 0x2d9   :  { %v2799_v62 = vpop.eup %2798  ;;  %1868 = vst.msk [vmem:[%s3745_s5 + $0x70] sm:$0xff] %vm1853_vm3, %v2797_v52  ;;  %2818 = vrcp.f32 %v1723_v43  ;;  %v2460_v13 = vpop.f32.mrb[56].mxu0  ;;  %v1659_v20 = vmul.f32 1.442695, %v1495_v56 }
 0x2da   :  { %v2801_v9 = vpop.eup %2800  ;;  %v1726_v26 = vadd.f32 1.0, %v2799_v62  ;;  %2820 = vpow2.f32 %v1655_v8  ;;  %v1510_v28 = vadd.f32 %v2460_v13, %v3488_v6  ;;  %v1504_v29 = vpop.f32.mrb[57].mxu0 }
 0x2db   :  { %v2803_v30 = vpop.eup %2802  ;;  %v1725_v31 = vadd.f32 1.0, %v2801_v9  ;;  %2822 = vpow2.f32 %v1661_v2  ;;  %v1505_v33 = vadd.f32 %v3488_v6, %v1504_v29 }
 0x2dc   :  { %v2805_v34 = vpop.eup %2804  ;;  %1871 = vst.msk [vmem:[%s3745_s5 + $0x88] sm:$0xff] %vm1853_vm3, %v2803_v30  ;;  %2824 = vrcp.f32 %v1726_v26  ;;  %v1665_v36 = vmul.f32 1.442695, %v1510_v28 }
 0x2dd   :  { %v2807_v37 = vpop.eup %2806  ;;  %1870 = vst.msk [vmem:[%s3745_s5 + $0x80] sm:$0xff] %vm1853_vm3, %v2805_v34  ;;  %2826 = vrcp.f32 %v1725_v31  ;;  %v2463_v38 = vpop.f32.mrb[58].mxu0  ;;  %v1663_v42 = vmul.f32 1.442695, %v1505_v33 }
 0x2de   :  { %v2809_v39 = vpop.eup %2808  ;;  %v1728_v40 = vadd.f32 1.0, %v2807_v37  ;;  %2828 = vpow2.f32 %v1659_v20  ;;  %v1520_v45 = vadd.f32 %v2463_v38, %v3488_v6  ;;  %v1514_v46 = vpop.f32.mrb[59].mxu0 }
 0x2df   :  { %v2811_v47 = vpop.eup %2810  ;;  %v1727_v48 = vadd.f32 1.0, %v2809_v39  ;;  %2830 = vpow2.f32 %v1665_v36  ;;  %v1515_v49 = vadd.f32 %v3488_v6, %v1514_v46 }
 0x2e0   :  { %v2813_v50 = vpop.eup %2812  ;;  %1873 = vst.msk [vmem:[%s3745_s5 + $0x98] sm:$0xff] %vm1853_vm3, %v2811_v47  ;;  %2832 = vrcp.f32 %v1728_v40  ;;  %v1669_v51 = vmul.f32 1.442695, %v1520_v45 }
 0x2e1   :  { %v2815_v53 = vpop.eup %2814  ;;  %2834 = vrcp.f32 %v1727_v48  ;;  %v1730_v54 = vadd.f32 1.0, %v2813_v50  ;;  %v1667_v55 = vmul.f32 1.442695, %v1515_v49  ;;  %v2466_v57 = vpop.f32.mrb[60].mxu0 }
 0x2e2   :  { %v2817_v58 = vpop.eup %2816  ;;  %1872 = vst.msk [vmem:[%s3745_s5 + $0x90] sm:$0xff] %vm1853_vm3, %v2815_v53  ;;  %2836 = vpow2.f32 %v1663_v42  ;;  %v1530_v59 = vadd.f32 %v2466_v57, %v3488_v6  ;;  %v1524_v60 = vpop.f32.mrb[61].mxu0 }
 0x2e3   :  { %v2819_v61 = vpop.eup %2818  ;;  %1875 = vst.msk [vmem:[%s3745_s5 + $0xa8] sm:$0xff] %vm1853_vm3, %v2817_v58  ;;  %2838 = vrcp.f32 %v1730_v54  ;;  %v1525_v63 = vadd.f32 %v3488_v6, %v1524_v60 }
 0x2e4   :  { %v2821_v0 = vpop.eup %2820  ;;  %1874 = vst.msk [vmem:[%s3745_s5 + $0xa0] sm:$0xff] %vm1853_vm3, %v2819_v61  ;;  %2840 = vpow2.f32 %v1669_v51  ;;  %v1673_v1 = vmul.f32 1.442695, %v1530_v59 }
 0x2e5   :  { %v2823_v21 = vpop.eup %2822  ;;  %v1729_v3 = vadd.f32 1.0, %v2821_v0  ;;  %2842 = vpow2.f32 %v1667_v55  ;;  %v1671_v4 = vmul.f32 1.442695, %v1525_v63  ;;  %v2469_v41 = vpop.f32.mrb[62].mxu0 }
 0x2e6   :  { %v2825_v5 = vpop.eup %2824  ;;  %v1732_v7 = vadd.f32 1.0, %v2823_v21  ;;  %2844 = vpow2.f32 %v1673_v1  ;;  %v1540_v10 = vadd.f32 %v2469_v41, %v3488_v6  ;;  %v1534_v11 = vpop.f32.mrb[63].mxu0 }
 0x2e7   :  { %v2827_v12 = vpop.eup %2826  ;;  %1877 = vst.msk [vmem:[%s3745_s5 + $0xb8] sm:$0xff] %vm1853_vm3, %v2825_v5  ;;  %2846 = vrcp.f32 %v1729_v3  ;;  %v1535_v27 = vadd.f32 %v3488_v6, %v1534_v11 }
 0x2e8   :  { %v2829_v18 = vpop.eup %2828  ;;  %1876 = vst.msk [vmem:[%s3745_s5 + $0xb0] sm:$0xff] %vm1853_vm3, %v2827_v12  ;;  %2848 = vrcp.f32 %v1732_v7  ;;  %v1677_v14 = vmul.f32 1.442695, %v1540_v10 }
 0x2e9   :  { %v2831_v15 = vpop.eup %2830  ;;  %v1731_v16 = vadd.f32 1.0, %v2829_v18  ;;  %2850 = vpow2.f32 %v1671_v4  ;;  %v1675_v17 = vmul.f32 1.442695, %v1535_v27  ;;  %v2472_v19 = vpop.f32.mrb[64].mxu0 }
 0x2ea   :  { %v2833_v35 = vpop.eup %2832  ;;  %v1734_v22 = vadd.f32 1.0, %v2831_v15  ;;  %2852 = vpow2.f32 %v1677_v14  ;;  %v1550_v24 = vadd.f32 %v2472_v19, %v3488_v6  ;;  %v1544_v23 = vpop.f32.mrb[65].mxu0 }
 0x2eb   :  { %v2835_v8 = vpop.eup %2834  ;;  %1879 = vst.msk [vmem:[%s3745_s5 + $0xc8] sm:$0xff] %vm1853_vm3, %v2833_v35  ;;  %2854 = vrcp.f32 %v1731_v16  ;;  %v1545_v32 = vadd.f32 %v3488_v6, %v1544_v23 }
 0x2ec   :  { %v2837_v44 = vpop.eup %2836  ;;  %1878 = vst.msk [vmem:[%s3745_s5 + $0xc0] sm:$0xff] %vm1853_vm3, %v2835_v8  ;;  %2856 = vrcp.f32 %v1734_v22  ;;  %v1681_v25 = vmul.f32 1.442695, %v1550_v24 }
 0x2ed   :  { %v2839_v43 = vpop.eup %2838  ;;  %v1733_v56 = vadd.f32 1.0, %v2837_v44  ;;  %2858 = vpow2.f32 %v1675_v17  ;;  %v1679_v52 = vmul.f32 1.442695, %v1545_v32  ;;  %v2475_v2 = vpop.f32.mrb[66].mxu0 }
 0x2ee   :  { %v2841_v62 = vpop.eup %2840  ;;  %1881 = vst.msk [vmem:[%s3745_s5 + $0xd8] sm:$0xff] %vm1853_vm3, %v2839_v43  ;;  %2860 = vpow2.f32 %v1681_v25  ;;  %v1560_v13 = vadd.f32 %v2475_v2, %v3488_v6  ;;  %v1554_v9 = vpop.f32.mrb[67].mxu0 }
 0x2ef   :  { %v2843_v26 = vpop.eup %2842  ;;  %2862 = vrcp.f32 %v1733_v56  ;;  %v1736_v20 = vadd.f32 1.0, %v2841_v62  ;;  %v1555_v28 = vadd.f32 %v3488_v6, %v1554_v9 }
 0x2f0   :  { %v2845_v29 = vpop.eup %2844  ;;  %v1735_v30 = vadd.f32 1.0, %v2843_v26  ;;  %2864 = vpow2.f32 %v1679_v52  ;;  %v1685_v31 = vmul.f32 1.442695, %v1560_v13 }
 0x2f1   :  { %v2847_v33 = vpop.eup %2846  ;;  %2866 = vrcp.f32 %v1736_v20  ;;  %v1738_v34 = vadd.f32 1.0, %v2845_v29  ;;  %v1683_v36 = vmul.f32 1.442695, %v1555_v28  ;;  %v2478_v37 = vpop.f32.mrb[68].mxu0 }
 0x2f2   :  { %v2849_v38 = vpop.eup %2848  ;;  %1880 = vst.msk [vmem:[%s3745_s5 + $0xd0] sm:$0xff] %vm1853_vm3, %v2847_v33  ;;  %2868 = vrcp.f32 %v1735_v30  ;;  %v1570_v39 = vadd.f32 %v2478_v37, %v3488_v6  ;;  %v1564_v40 = vpop.f32.mrb[69].mxu0 }
 0x2f3   :  { %v2851_v42 = vpop.eup %2850  ;;  %1883 = vst.msk [vmem:[%s3745_s5 + $0xe8] sm:$0xff] %vm1853_vm3, %v2849_v38  ;;  %2870 = vrcp.f32 %v1738_v34  ;;  %v1565_v45 = vadd.f32 %v3488_v6, %v1564_v40 }
 0x2f4   :  { %v2853_v46 = vpop.eup %2852  ;;  %v1737_v47 = vadd.f32 1.0, %v2851_v42  ;;  %2872 = vpow2.f32 %v1685_v31  ;;  %v1689_v48 = vmul.f32 1.442695, %v1570_v39 }
 0x2f5   :  { %v2855_v49 = vpop.eup %2854  ;;  %v1740_v50 = vadd.f32 1.0, %v2853_v46  ;;  %2874 = vpow2.f32 %v1683_v36  ;;  %v1687_v51 = vmul.f32 1.442695, %v1565_v45  ;;  %v2481_v53 = vpop.f32.mrb[70].mxu0 }
 0x2f6   :  { %v2857_v54 = vpop.eup %2856  ;;  %1882 = vst.msk [vmem:[%s3745_s5 + $0xe0] sm:$0xff] %vm1853_vm3, %v2855_v49  ;;  %2876 = vrcp.f32 %v1737_v47  ;;  %v1580_v55 = vadd.f32 %v2481_v53, %v3488_v6  ;;  %v1574_v57 = vpop.f32.mrb[71].mxu0 }
 0x2f7   :  { %v2859_v58 = vpop.eup %2858  ;;  %1885 = vst.msk [vmem:[%s3745_s5 + $0xf8] sm:$0xff] %vm1853_vm3, %v2857_v54  ;;  %2878 = vrcp.f32 %v1740_v50  ;;  %v1575_v59 = vadd.f32 %v3488_v6, %v1574_v57 }
 0x2f8   :  { %v2861_v60 = vpop.eup %2860  ;;  %v1739_v61 = vadd.f32 1.0, %v2859_v58  ;;  %2880 = vpow2.f32 %v1689_v48  ;;  %v1693_v63 = vmul.f32 1.442695, %v1580_v55 }
 0x2f9   :  { %v2863_v0 = vpop.eup %2862  ;;  %v1742_v1 = vadd.f32 1.0, %v2861_v60  ;;  %2882 = vpow2.f32 %v1687_v51  ;;  %v2484_v21 = vpop.f32.mrb[72].mxu0  ;;  %v1691_v4 = vmul.f32 1.442695, %v1575_v59 }
 0x2fa   :  { %v2865_v3 = vpop.eup %2864  ;;  %1884 = vst.msk [vmem:[%s3745_s5 + $0xf0] sm:$0xff] %vm1853_vm3, %v2863_v0  ;;  %2884 = vrcp.f32 %v1739_v61  ;;  %v1590_v41 = vadd.f32 %v2484_v21, %v3488_v6  ;;  %v1584_v5 = vpop.f32.mrb[73].mxu0 }
 0x2fb   :  { %v2867_v7 = vpop.eup %2866  ;;  %2886 = vrcp.f32 %v1742_v1  ;;  %v1741_v10 = vadd.f32 1.0, %v2865_v3  ;;  %v1585_v11 = vadd.f32 %v3488_v6, %v1584_v5 }
 0x2fc   :  { %v2869_v12 = vpop.eup %2868  ;;  %1887 = vst.msk [vmem:[%s3745_s5 + $0x108] sm:$0xff] %vm1853_vm3, %v2867_v7  ;;  %2888 = vpow2.f32 %v1693_v63  ;;  %v1697_v27 = vmul.f32 1.442695, %v1590_v41 }
 0x2fd   :  { %v2871_v18 = vpop.eup %2870  ;;  %1886 = vst.msk [vmem:[%s3745_s5 + $0x100] sm:$0xff] %vm1853_vm3, %v2869_v12  ;;  %2890 = vrcp.f32 %v1741_v10  ;;  %v1695_v14 = vmul.f32 1.442695, %v1585_v11  ;;  %v2487_v15 = vpop.f32.mrb[74].mxu0 }
 0x2fe   :  { %v2873_v16 = vpop.eup %2872  ;;  %1889 = vst.msk [vmem:[%s3745_s5 + $0x118] sm:$0xff] %vm1853_vm3, %v2871_v18  ;;  %2892 = vpow2.f32 %v1691_v4  ;;  %v1600_v17 = vadd.f32 %v2487_v15, %v3488_v6  ;;  %v1594_v19 = vpop.f32.mrb[75].mxu0 }
 0x2ff   :  { %v2875_v35 = vpop.eup %2874  ;;  %v1744_v22 = vadd.f32 1.0, %v2873_v16  ;;  %2894 = vpow2.f32 %v1697_v27  ;;  %v1595_v24 = vadd.f32 %v3488_v6, %v1594_v19 }
 0x300   :  { %v2877_v23 = vpop.eup %2876  ;;  %v1743_v8 = vadd.f32 1.0, %v2875_v35  ;;  %2896 = vpow2.f32 %v1695_v14  ;;  %v1701_v32 = vmul.f32 1.442695, %v1600_v17 }
 0x301   :  { %v2879_v44 = vpop.eup %2878  ;;  %1888 = vst.msk [vmem:[%s3745_s5 + $0x110] sm:$0xff] %vm1853_vm3, %v2877_v23  ;;  %2898 = vrcp.f32 %v1744_v22  ;;  %v1699_v25 = vmul.f32 1.442695, %v1595_v24 }
 0x302   :  { %v2881_v43 = vpop.eup %2880  ;;  %1891 = vst.msk [vmem:[%s3745_s5 + $0x128] sm:$0xff] %vm1853_vm3, %v2879_v44  ;;  %2900 = vrcp.f32 %v1743_v8 }
 0x303   :  { %v2883_v6 = vpop.eup %2882  ;;  %v1746_v56 = vadd.f32 1.0, %v2881_v43  ;;  %2902 = vpow2.f32 %v1701_v32 }
 0x304   :  { %v2885_v52 = vpop.eup %2884  ;;  %v1745_v2 = vadd.f32 1.0, %v2883_v6  ;;  %2904 = vpow2.f32 %v1699_v25 }
 0x305   :  { %v2887_v62 = vpop.eup %2886  ;;  %1890 = vst.msk [vmem:[%s3745_s5 + $0x120] sm:$0xff] %vm1853_vm3, %v2885_v52  ;;  %2906 = vrcp.f32 %v1746_v56 }
 0x306   :  { %v2889_v13 = vpop.eup %2888  ;;  %1893 = vst.msk [vmem:[%s3745_s5 + $0x138] sm:$0xff] %vm1853_vm3, %v2887_v62  ;;  %2908 = vrcp.f32 %v1745_v2 }
 0x307   :  { %v2891_v9 = vpop.eup %2890  ;;  %v1748_v26 = vadd.f32 1.0, %v2889_v13 }
 0x308   :  { %v2893_v20 = vpop.eup %2892  ;;  %1892 = vst.msk [vmem:[%s3745_s5 + $0x130] sm:$0xff] %vm1853_vm3, %v2891_v9 }
 0x309   :  { %v2895_v28 = vpop.eup %2894  ;;  %2910 = vrcp.f32 %v1748_v26  ;;  %v1747_v29 = vadd.f32 1.0, %v2893_v20 }
 0x30a   :  { %v2897_v30 = vpop.eup %2896  ;;  %v1750_v31 = vadd.f32 1.0, %v2895_v28 }
 0x30b   :  { %v2899_v33 = vpop.eup %2898  ;;  %2912 = vrcp.f32 %v1747_v29  ;;  %v1749_v34 = vadd.f32 1.0, %v2897_v30 }
 0x30c   :  { %v2901_v36 = vpop.eup %2900  ;;  %1895 = vst.msk [vmem:[%s3745_s5 + $0x148] sm:$0xff] %vm1853_vm3, %v2899_v33  ;;  %2914 = vrcp.f32 %v1750_v31 }
 0x30d   :  { %v2903_v37 = vpop.eup %2902  ;;  %1894 = vst.msk [vmem:[%s3745_s5 + $0x140] sm:$0xff] %vm1853_vm3, %v2901_v36  ;;  %2916 = vrcp.f32 %v1749_v34 }
 0x30e   :  { %v2905_v38 = vpop.eup %2904  ;;  %v1752_v39 = vadd.f32 1.0, %v2903_v37 }
 0x30f   :  { %v2907_v40 = vpop.eup %2906  ;;  %v1751_v42 = vadd.f32 1.0, %v2905_v38 }
 0x310   :  { %v2909_v45 = vpop.eup %2908  ;;  %1897 = vst.msk [vmem:[%s3745_s5 + $0x158] sm:$0xff] %vm1853_vm3, %v2907_v40  ;;  %2918 = vrcp.f32 %v1752_v39 }
 0x311   :  { %1896 = vst.msk [vmem:[%s3745_s5 + $0x150] sm:$0xff] %vm1853_vm3, %v2909_v45  ;;  %2920 = vrcp.f32 %v1751_v42 }
 0x313   :  { %v2911_v46 = vpop.eup %2910 }
 0x314   :  { %1899 = vst.msk [vmem:[%s3745_s5 + $0x168] sm:$0xff] %vm1853_vm3, %v2911_v46 }
 0x315   :  { %v2913_v47 = vpop.eup %2912 }
 0x316   :  { %v2915_v48 = vpop.eup %2914  ;;  %1898 = vst.msk [vmem:[%s3745_s5 + $0x160] sm:$0xff] %vm1853_vm3, %v2913_v47 }
 0x317   :  { %v2917_v49 = vpop.eup %2916  ;;  %1901 = vst.msk [vmem:[%s3745_s5 + $0x178] sm:$0xff] %vm1853_vm3, %v2915_v48 }
 0x318   :  { %1900 = vst.msk [vmem:[%s3745_s5 + $0x170] sm:$0xff] %vm1853_vm3, %v2917_v49 }
 0x31a   :  { %v2919_v50 = vpop.eup %2918 }
 0x31b   :  { %v2921_v51 = vpop.eup %2920  ;;  %1903 = vst.msk [vmem:[%s3745_s5 + $0x188] sm:$0xff] %vm1853_vm3, %v2919_v50 }
 0x31c   :  { %1902 = vst.msk [vmem:[%s3745_s5 + $0x180] sm:$0xff] %vm1853_vm3, %v2921_v51 }

</bundles_post_ra>
